<compile_context>
chip_gen: v7x
topology: tpu7x:2x2x1
jax: 0.10.0
libtpu: 0.0.40
codegen_flags: <defaults>
</compile_context>

<pallas_src>
import functools

import jax
import jax.numpy as jnp
from jax.experimental import pallas as pl
from jax.experimental.pallas import tpu as pltpu

_LANES = 128
_SUBLANES = 8
_FEAT = 256          # backbone 'p6' channel count


def _vmem_limit_bytes():
    """Generation-aware scoped-VMEM budget (safe on v5e/v6e/v7x)."""
    try:
        cap = int(pltpu.get_tpu_info().vmem_capacity_bytes)
    except Exception:
        cap = 64 * 1024 * 1024          # conservative (v7x physical VMEM)
    return min(cap * 3 // 4, 96 * 1024 * 1024)


def _yoga_kernel(x_ref, wconv_ref, bconv_ref, w1_ref, b1_ref, w2_ref, b2_ref,
                 out_ref, acc_ref, *, block_b):
    k = pl.program_id(1)

    @pl.when(k == 0)
    def _():
        acc_ref[...] = jnp.zeros_like(acc_ref)

    # Backbone stub: 1x1 conv (Cin_pad -> 256) + ReLU, preprocess folded into
    # the weights.  x tile is (block_b, Cin_pad, hw_tile) -- HW on lanes, so
    # the lhs of each per-sample dot is already in its natural (K, M) layout
    # (trans_a matmul); K = Cin is degenerate for the MXU, which is fine.
    parts = []
    for b in range(block_b):                              # static unroll, <= 8
        feat = jax.lax.dot_general(
            x_ref[b], wconv_ref[...],
            dimension_numbers=(((0,), (0,)), ((), ())),
            preferred_element_type=jnp.float32)           # (hw_tile, 256)
        feat = jnp.maximum(feat + bconv_ref[...], 0.0)
        # Partial AdaptiveAvgPool2d((1,1)): per-tile channel sum (the 1/HW and
        # the zero-padded-pixel correction are folded into fc1 on the host).
        parts.append(jnp.sum(feat, axis=0, keepdims=True))  # (1, 256)
    acc_ref[...] += jnp.concatenate(parts, axis=0)           # (block_b, 256)

    @pl.when(k == pl.num_programs(1) - 1)
    def _():
        # fc1 (+ BatchNorm1d inference stats + 1/HW folded; hidden padded to
        # 128 lanes) -> ReLU.
        h = jnp.maximum(
            jnp.dot(acc_ref[...], w1_ref[...],
                    preferred_element_type=jnp.float32) + b1_ref[...], 0.0)
        # fc2 (classes padded to 128 lanes; pad bias -1e30 => exp() == 0) and
        # softmax; exact reciprocal keeps the 1e-5 sum-to-1 check valid.
        logits = jnp.dot(h, w2_ref[...],
                         preferred_element_type=jnp.float32) + b2_ref[...]
        m = jnp.max(logits, axis=-1, keepdims=True)
        e = jnp.exp(logits - m)
        inv = pl.reciprocal(jnp.sum(e, axis=-1, keepdims=True), approx=False)
        out_ref[...] = e * inv                            # (block_b, 128)


def fold_params(params, hw, hw_pad):
    """Fold preprocess/BN/pool-scale into weights; pad Cin, hidden, classes."""
    cin = params["wconv"].shape[0]
    nh = params["w1"].shape[1]
    nc = params["w2"].shape[1]
    cin_pad = pl.cdiv(cin, _SUBLANES) * _SUBLANES
    nh_pad = pl.cdiv(nh, _LANES) * _LANES
    nc_pad = pl.cdiv(nc, _LANES) * _LANES

    mean = params["pixel_mean"].reshape(cin)
    std = params["pixel_std"].reshape(cin)

    # (x - mean)/std @ Wc + bc  ==  x @ (Wc/std) + (bc - (mean/std) @ Wc)
    wconv = params["wconv"] / std[:, None]
    bconv = params["bconv"].reshape(1, -1) - (mean / std)[None, :] @ params["wconv"]
    wconv = jnp.zeros((cin_pad, _FEAT), jnp.float32).at[:cin, :].set(wconv)

    # BatchNorm1d (inference) folded into fc1:
    #   (pooled @ W1 + b1) * s + t  ==  pooled @ (W1*s) + (b1*s + t)
    bn_s = params["bn_scale"].reshape(1, nh)
    bn_t = params["bn_shift"].reshape(1, nh)
    w1 = params["w1"] * bn_s
    b1 = params["b1"].reshape(1, nh) * bn_s + bn_t
    # Fold the average-pool scale (1/hw) and the correction for zero-padded HW
    # columns: the kernel accumulates sum over hw_pad pixels, where each padded
    # (all-zero) pixel contributes relu(bconv).
    corr = (hw_pad - hw) * jnp.maximum(bconv, 0.0)        # (1, 256)
    b1 = b1 - (corr @ w1) / hw
    w1 = w1 / hw
    # Pad hidden 64 -> 128 so h is lane dense and fc2's K is 128.
    w1 = jnp.zeros((_FEAT, nh_pad), jnp.float32).at[:, :nh].set(w1)
    b1 = jnp.zeros((1, nh_pad), jnp.float32).at[:, :nh].set(b1)

    # Pad classes -> 128 lanes; -1e30 bias makes padded logits exp() to 0.
    w2 = jnp.zeros((nh_pad, nc_pad), jnp.float32).at[:nh, :nc].set(params["w2"])
    b2 = jnp.full((1, nc_pad), -1e30, jnp.float32).at[:, :nc].set(
        params["b2"].reshape(1, -1))
    return wconv, bconv, w1, b1, w2, b2


def yoga_pose_forward(x_nchw, params, *, block_b=None, hw_tile=None):
    """Forward pass of YogaPoseEstimatorModel.  x_nchw: (N, Cin, H, W) f32."""
    N, cin, H, W = x_nchw.shape
    hw = H * W
    nc = params["w2"].shape[1]
    cin_pad = pl.cdiv(cin, _SUBLANES) * _SUBLANES

    # HW tiling: lane-dense tiles, capped so the per-step feature slab stays a
    # few MiB (fits v7x's 64 MiB VMEM at real resolutions while keeping the x
    # DMA double-buffered).  For larger images sweep hw_tile / pl.Buffered(3).
    if hw_tile is None:
        hw_tile = min(pl.cdiv(hw, _LANES) * _LANES, 1024)
    hw_tile = pl.cdiv(hw_tile, _LANES) * _LANES
    n_hw_tiles = pl.cdiv(hw, hw_tile)
    hw_pad = n_hw_tiles * hw_tile

    # Batch blocking: <= 8 samples per step; batches >= 16 give >= 2 "parallel"
    # blocks so v7x's second TensorCore has work.  Tiny batches use one block.
    if block_b is None:
        block_b = N if N < _SUBLANES else _SUBLANES
    n_blocks = pl.cdiv(N, block_b)
    n_pad = n_blocks * block_b

    wconv, bconv, w1, b1, w2, b2 = fold_params(params, hw, hw_pad)
    nc_pad = w2.shape[1]

    # NCHW is already channel-major per sample: flatten H*W (lane axis) and
    # zero-pad channels -> 8 sublanes, HW -> hw_pad, batch -> n_pad.
    x = x_nchw.reshape(N, cin, hw)
    x = jnp.pad(x, ((0, n_pad - N), (0, cin_pad - cin), (0, hw_pad - hw)))

    rep = lambda arr: pl.BlockSpec(arr.shape, lambda i, k: (0, 0))

    out = pl.pallas_call(
        functools.partial(_yoga_kernel, block_b=block_b),
        out_shape=jax.ShapeDtypeStruct((n_pad, nc_pad), jnp.float32),
        grid=(n_blocks, n_hw_tiles),
        in_specs=[
            pl.BlockSpec((block_b, cin_pad, hw_tile), lambda i, k: (i, 0, k)),
            rep(wconv), rep(bconv), rep(w1), rep(b1), rep(w2), rep(b2),
        ],
        out_specs=pl.BlockSpec((block_b, nc_pad), lambda i, k: (i, 0)),
        scratch_shapes=[pltpu.VMEM((block_b, _FEAT), jnp.float32)],
        compiler_params=pltpu.CompilerParams(
            dimension_semantics=("parallel", "arbitrary"),
            vmem_limit_bytes=_vmem_limit_bytes()),
    )(x, wconv, bconv, w1, b1, w2, b2)

    return out[:N, :nc]


def reference_forward(x_nchw, params):
    """Pure-JAX reference with the original (unfolded) module semantics."""
    N, cin, H, W = x_nchw.shape
    x = (x_nchw - params["pixel_mean"].reshape(1, cin, 1, 1)) \
        / params["pixel_std"].reshape(1, cin, 1, 1)
    x = x.reshape(N, cin, H * W)
    feat = jnp.maximum(
        jnp.einsum("ncs,cf->nsf", x, params["wconv"])
        + params["bconv"].reshape(1, 1, -1), 0.0)
    pooled = jnp.mean(feat, axis=1)                                 # (N, 256)
    h = pooled @ params["w1"] + params["b1"].reshape(1, -1)
    h = jnp.maximum(h * params["bn_scale"].reshape(1, -1)
                    + params["bn_shift"].reshape(1, -1), 0.0)
    logits = h @ params["w2"] + params["b2"].reshape(1, -1)
    return jax.nn.softmax(logits, axis=1)


def folded_reference_forward(x_nchw, params):
    """Exactly the kernel's folded math, in plain JAX (tight check)."""
    N, cin, H, W = x_nchw.shape
    hw = H * W
    nc = params["w2"].shape[1]
    wconv, bconv, w1, b1, w2, b2 = fold_params(params, hw, hw)
    x = x_nchw.reshape(N, cin, hw)
    x = jnp.pad(x, ((0, 0), (0, wconv.shape[0] - cin), (0, 0)))
    feat = jnp.maximum(jnp.einsum("ncs,cf->nsf", x, wconv) + bconv[None], 0.0)
    acc = jnp.sum(feat, axis=1)                                     # (N, 256)
    h = jnp.maximum(acc @ w1 + b1, 0.0)
    logits = h @ w2 + b2
    return jax.nn.softmax(logits, axis=1)[:, :nc]


def make_params(key, cin, num_classes):
    ks = jax.random.split(key, 10)
    eps = 1e-5
    gamma = 1.0 + 0.1 * jax.random.normal(ks[0], (64,), jnp.float32)
    beta = 0.1 * jax.random.normal(ks[1], (64,), jnp.float32)
    run_mean = 0.05 * jax.random.normal(ks[2], (64,), jnp.float32)
    run_var = jnp.abs(1.0 + 0.1 * jax.random.normal(ks[3], (64,), jnp.float32))
    bn_scale = gamma / jnp.sqrt(run_var + eps)
    bn_shift = beta - run_mean * bn_scale
    return {
        "pixel_mean": jnp.array([0.485, 0.456, 0.406, 0.5], jnp.float32)[:cin],
        "pixel_std":  jnp.array([0.229, 0.224, 0.225, 0.25], jnp.float32)[:cin],
        "wconv": 0.1 * jax.random.normal(ks[4], (cin, 256), jnp.float32),
        "bconv": 0.05 * jax.random.normal(ks[5], (256,), jnp.float32),
        "w1":    0.1 * jax.random.normal(ks[6], (256, 64), jnp.float32),
        "b1":    0.05 * jax.random.normal(ks[7], (64,), jnp.float32),
        "bn_scale": bn_scale,
        "bn_shift": bn_shift,
        "w2":    0.1 * jax.random.normal(ks[8], (64, num_classes), jnp.float32),
        "b2":    0.05 * jax.random.normal(ks[9], (num_classes,), jnp.float32),
    }


if __name__ == "__main__":
    N, C, H, W = 2, 4, 16, 16
    NUM_CLASSES = 8

    key = jax.random.PRNGKey(0)
    kx, kp = jax.random.split(key)

    x_nchw = jax.random.uniform(kx, (N, C, H, W), jnp.float32)
    params = make_params(kp, C, NUM_CLASSES)

    out = yoga_pose_forward(x_nchw, params)
    out = jax.block_until_ready(out)

    assert out.shape == (N, NUM_CLASSES)
    assert jnp.allclose(jnp.sum(out, axis=1), 1.0, atol=1e-5)

    # Tight check: kernel vs. identical folded math in plain JAX.
    ref_folded = folded_reference_forward(x_nchw, params)
    assert jnp.allclose(out, ref_folded, atol=1e-5, rtol=1e-5)

    # Semantic check vs. the original (unfolded) module math; looser tolerance
    # absorbs the algebraic re-association introduced by the weight folding.
    ref = reference_forward(x_nchw, params)
    assert jnp.allclose(out, ref, atol=2e-3, rtol=2e-3)

    print("KERNEL_OK")
</pallas_src>

<mosaic_0001>
module attributes {stable_mosaic.version = 11 : i64} {
  func.func @_yoga_kernel(%arg0: i32, %arg1: i32, %arg2: memref<2x8x256xf32, #tpu.memory_space<vmem>>, %arg3: memref<8x256xf32, #tpu.memory_space<vmem>>, %arg4: memref<1x256xf32, #tpu.memory_space<vmem>>, %arg5: memref<256x128xf32, #tpu.memory_space<vmem>>, %arg6: memref<1x128xf32, #tpu.memory_space<vmem>>, %arg7: memref<128x128xf32, #tpu.memory_space<vmem>>, %arg8: memref<1x128xf32, #tpu.memory_space<vmem>>, %arg9: memref<2x128xf32, #tpu.memory_space<vmem>>, %arg10: memref<2x256xf32, #tpu.memory_space<vmem>>) attributes {dimension_semantics = [#tpu.dimension_semantics<parallel>, #tpu.dimension_semantics<arbitrary>], iteration_bounds = array<i64: 1, 1>, scalar_prefetch = 0 : i64, scratch_operands = 1 : i64, tpu.core_type = #tpu.core_type<tc>, window_params = [{transform_indices = @transform_0, window_bounds = array<i64: 2, 8, 256>}, {pipeline_mode = #tpu.pipeline_mode<synchronous>, transform_indices = @transform_1, window_bounds = array<i64: 8, 256>}, {pipeline_mode = #tpu.pipeline_mode<synchronous>, transform_indices = @transform_2, window_bounds = array<i64: 1, 256>}, {pipeline_mode = #tpu.pipeline_mode<synchronous>, transform_indices = @transform_3, window_bounds = array<i64: 256, 128>}, {pipeline_mode = #tpu.pipeline_mode<synchronous>, transform_indices = @transform_4, window_bounds = array<i64: 1, 128>}, {pipeline_mode = #tpu.pipeline_mode<synchronous>, transform_indices = @transform_5, window_bounds = array<i64: 128, 128>}, {pipeline_mode = #tpu.pipeline_mode<synchronous>, transform_indices = @transform_6, window_bounds = array<i64: 1, 128>}, {transform_indices = @transform_7, window_bounds = array<i64: 2, 128>}]} {
    %c0_i32 = arith.constant 0 : i32
    %0 = arith.cmpi eq, %arg1, %c0_i32 : i32
    %1 = arith.extui %0 : i1 to i32
    %c0_i32_0 = arith.constant 0 : i32
    %2 = arith.cmpi ne, %1, %c0_i32_0 : i32
    scf.if %2 {
      %cst_24 = arith.constant 0.000000e+00 : f32
      %32 = vector.broadcast %cst_24 : f32 to vector<2x256xf32>
      %c0_25 = arith.constant 0 : index
      %c0_26 = arith.constant 0 : index
      %33 = vector.load %arg10[%c0_25, %c0_26] : memref<2x256xf32, #tpu.memory_space<vmem>>, vector<2x256xf32>
      tpu.vector_store %arg10[%c0_25, %c0_26], %32 {strides = array<i32>} : memref<2x256xf32, #tpu.memory_space<vmem>>, vector<2x256xf32>,
    } else {
    }
    %c0 = arith.constant 0 : index
    %c0_1 = arith.constant 0 : index
    %c0_2 = arith.constant 0 : index
    %3 = vector.load %arg2[%c0, %c0_1, %c0_2] : memref<2x8x256xf32, #tpu.memory_space<vmem>>, vector<1x8x256xf32>
    %4 = vector.shape_cast %3 : vector<1x8x256xf32> to vector<8x256xf32>
    %c0_3 = arith.constant 0 : index
    %c0_4 = arith.constant 0 : index
    %5 = vector.load %arg3[%c0_3, %c0_4] : memref<8x256xf32, #tpu.memory_space<vmem>>, vector<8x256xf32>
    %cst = arith.constant dense<0.000000e+00> : vector<256x256xf32>
    %6 = tpu.matmul %4, %5, %cst {dimension_numbers = #tpu.dot_dimension_numbers<[0], [0], [1], [1], [0, 1, 1, 1], [], []>} : vector<8x256xf32>, vector<8x256xf32>, vector<256x256xf32> -> vector<256x256xf32>
    %c0_5 = arith.constant 0 : index
    %c0_6 = arith.constant 0 : index
    %7 = vector.load %arg4[%c0_5, %c0_6] : memref<1x256xf32, #tpu.memory_space<vmem>>, vector<1x256xf32>
    %8 = vector.broadcast %7 : vector<1x256xf32> to vector<256x256xf32>
    %9 = arith.addf %6, %8 : vector<256x256xf32>
    %cst_7 = arith.constant 0.000000e+00 : f32
    %10 = vector.broadcast %cst_7 : f32 to vector<256x256xf32>
    %11 = arith.maximumf %9, %10 : vector<256x256xf32>
    %cst_8 = arith.constant dense<0.000000e+00> : vector<256xf32>
    %12 = vector.multi_reduction <add>, %11, %cst_8 [0] : vector<256x256xf32> to vector<256xf32>
    %13 = vector.shape_cast %12 : vector<256xf32> to vector<1x256xf32>
    %c1 = arith.constant 1 : index
    %c0_9 = arith.constant 0 : index
    %c0_10 = arith.constant 0 : index
    %14 = vector.load %arg2[%c1, %c0_9, %c0_10] : memref<2x8x256xf32, #tpu.memory_space<vmem>>, vector<1x8x256xf32>
    %15 = vector.shape_cast %14 : vector<1x8x256xf32> to vector<8x256xf32>
    %c0_11 = arith.constant 0 : index
    %c0_12 = arith.constant 0 : index
    %16 = vector.load %arg3[%c0_11, %c0_12] : memref<8x256xf32, #tpu.memory_space<vmem>>, vector<8x256xf32>
    %cst_13 = arith.constant dense<0.000000e+00> : vector<256x256xf32>
    %17 = tpu.matmul %15, %16, %cst_13 {dimension_numbers = #tpu.dot_dimension_numbers<[0], [0], [1], [1], [0, 1, 1, 1], [], []>} : vector<8x256xf32>, vector<8x256xf32>, vector<256x256xf32> -> vector<256x256xf32>
    %c0_14 = arith.constant 0 : index
    %c0_15 = arith.constant 0 : index
    %18 = vector.load %arg4[%c0_14, %c0_15] : memref<1x256xf32, #tpu.memory_space<vmem>>, vector<1x256xf32>
    %19 = vector.broadcast %18 : vector<1x256xf32> to vector<256x256xf32>
    %20 = arith.addf %17, %19 : vector<256x256xf32>
    %cst_16 = arith.constant 0.000000e+00 : f32
    %21 = vector.broadcast %cst_16 : f32 to vector<256x256xf32>
    %22 = arith.maximumf %20, %21 : vector<256x256xf32>
    %cst_17 = arith.constant dense<0.000000e+00> : vector<256xf32>
    %23 = vector.multi_reduction <add>, %22, %cst_17 [0] : vector<256x256xf32> to vector<256xf32>
    %24 = vector.shape_cast %23 : vector<256xf32> to vector<1x256xf32>
    %c0_18 = arith.constant 0 : index
    %c0_19 = arith.constant 0 : index
    %25 = vector.load %arg10[%c0_18, %c0_19] : memref<2x256xf32, #tpu.memory_space<vmem>>, vector<2x256xf32>
    %26 = tpu.concatenate %13, %24 in 0 : vector<1x256xf32>, vector<1x256xf32> -> vector<2x256xf32>
    %27 = arith.addf %25, %26 : vector<2x256xf32>
    %c0_20 = arith.constant 0 : index
    %c0_21 = arith.constant 0 : index
    %28 = vector.load %arg10[%c0_20, %c0_21] : memref<2x256xf32, #tpu.memory_space<vmem>>, vector<2x256xf32>
    tpu.vector_store %arg10[%c0_20, %c0_21], %27 {strides = array<i32>} : memref<2x256xf32, #tpu.memory_space<vmem>>, vector<2x256xf32>,
    %c0_i32_22 = arith.constant 0 : i32
    %29 = arith.cmpi eq, %arg1, %c0_i32_22 : i32
    %30 = arith.extui %29 : i1 to i32
    %c0_i32_23 = arith.constant 0 : i32
    %31 = arith.cmpi ne, %30, %c0_i32_23 : i32
    scf.if %31 {
      %c0_24 = arith.constant 0 : index
      %c0_25 = arith.constant 0 : index
      %32 = vector.load %arg10[%c0_24, %c0_25] : memref<2x256xf32, #tpu.memory_space<vmem>>, vector<2x256xf32>
      %c0_26 = arith.constant 0 : index
      %c0_27 = arith.constant 0 : index
      %33 = vector.load %arg5[%c0_26, %c0_27] : memref<256x128xf32, #tpu.memory_space<vmem>>, vector<256x128xf32>
      %cst_28 = arith.constant dense<0.000000e+00> : vector<2x128xf32>
      %34 = tpu.matmul %32, %33, %cst_28 {dimension_numbers = #tpu.dot_dimension_numbers<[1], [0], [0], [1], [0, 0, 1, 1], [], []>} : vector<2x256xf32>, vector<256x128xf32>, vector<2x128xf32> -> vector<2x128xf32>
      %c0_29 = arith.constant 0 : index
      %c0_30 = arith.constant 0 : index
      %35 = vector.load %arg6[%c0_29, %c0_30] : memref<1x128xf32, #tpu.memory_space<vmem>>, vector<1x128xf32>
      %36 = vector.broadcast %35 : vector<1x128xf32> to vector<2x128xf32>
      %37 = arith.addf %34, %36 : vector<2x128xf32>
      %cst_31 = arith.constant 0.000000e+00 : f32
      %38 = vector.broadcast %cst_31 : f32 to vector<2x128xf32>
      %39 = arith.maximumf %37, %38 : vector<2x128xf32>
      %c0_32 = arith.constant 0 : index
      %c0_33 = arith.constant 0 : index
      %40 = vector.load %arg7[%c0_32, %c0_33] : memref<128x128xf32, #tpu.memory_space<vmem>>, vector<128x128xf32>
      %cst_34 = arith.constant dense<0.000000e+00> : vector<2x128xf32>
      %41 = tpu.matmul %39, %40, %cst_34 {dimension_numbers = #tpu.dot_dimension_numbers<[1], [0], [0], [1], [0, 0, 1, 1], [], []>} : vector<2x128xf32>, vector<128x128xf32>, vector<2x128xf32> -> vector<2x128xf32>
      %c0_35 = arith.constant 0 : index
      %c0_36 = arith.constant 0 : index
      %42 = vector.load %arg8[%c0_35, %c0_36] : memref<1x128xf32, #tpu.memory_space<vmem>>, vector<1x128xf32>
      %43 = vector.broadcast %42 : vector<1x128xf32> to vector<2x128xf32>
      %44 = arith.addf %41, %43 : vector<2x128xf32>
      %cst_37 = arith.constant dense<0xFF800000> : vector<2xf32>
      %45 = vector.multi_reduction <maximumf>, %44, %cst_37 [1] : vector<2x128xf32> to vector<2xf32>
      %46 = vector.shape_cast %45 : vector<2xf32> to vector<2x1xf32>
      %47 = vector.broadcast %46 : vector<2x1xf32> to vector<2x128xf32>
      %48 = arith.subf %44, %47 : vector<2x128xf32>
      %49 = math.exp %48 : vector<2x128xf32>
      %cst_38 = arith.constant dense<0.000000e+00> : vector<2xf32>
      %50 = vector.multi_reduction <add>, %49, %cst_38 [1] : vector<2x128xf32> to vector<2xf32>
      %51 = vector.shape_cast %50 : vector<2xf32> to vector<2x1xf32>
      %52 = tpu.reciprocal %51 : vector<2x1xf32> -> vector<2x1xf32>
      %53 = vector.broadcast %52 : vector<2x1xf32> to vector<2x128xf32>
      %54 = arith.mulf %49, %53 : vector<2x128xf32>
      %c0_39 = arith.constant 0 : index
      %c0_40 = arith.constant 0 : index
      %55 = vector.load %arg9[%c0_39, %c0_40] : memref<2x128xf32, #tpu.memory_space<vmem>>, vector<2x128xf32>
      tpu.vector_store %arg9[%c0_39, %c0_40], %54 {strides = array<i32>} : memref<2x128xf32, #tpu.memory_space<vmem>>, vector<2x128xf32>,
    } else {
    }
    return
  }
  func.func @transform_0(%arg0: i32, %arg1: i32) -> (i32, i32, i32) {
    %c0_i32 = arith.constant 0 : i32
    %c0_i32_0 = arith.constant 0 : i32
    return %arg0, %c0_i32, %arg1 : i32, i32, i32
  }
  func.func @transform_1(%arg0: i32, %arg1: i32) -> (i32, i32) {
    %c0_i32 = arith.constant 0 : i32
    %c0_i32_0 = arith.constant 0 : i32
    %c0_i32_1 = arith.constant 0 : i32
    return %c0_i32, %c0_i32_0 : i32, i32
  }
  func.func @transform_2(%arg0: i32, %arg1: i32) -> (i32, i32) {
    %c0_i32 = arith.constant 0 : i32
    %c0_i32_0 = arith.constant 0 : i32
    %c0_i32_1 = arith.constant 0 : i32
    return %c0_i32, %c0_i32_0 : i32, i32
  }
  func.func @transform_3(%arg0: i32, %arg1: i32) -> (i32, i32) {
    %c0_i32 = arith.constant 0 : i32
    %c0_i32_0 = arith.constant 0 : i32
    %c0_i32_1 = arith.constant 0 : i32
    return %c0_i32, %c0_i32_0 : i32, i32
  }
  func.func @transform_4(%arg0: i32, %arg1: i32) -> (i32, i32) {
    %c0_i32 = arith.constant 0 : i32
    %c0_i32_0 = arith.constant 0 : i32
    %c0_i32_1 = arith.constant 0 : i32
    return %c0_i32, %c0_i32_0 : i32, i32
  }
  func.func @transform_5(%arg0: i32, %arg1: i32) -> (i32, i32) {
    %c0_i32 = arith.constant 0 : i32
    %c0_i32_0 = arith.constant 0 : i32
    %c0_i32_1 = arith.constant 0 : i32
    return %c0_i32, %c0_i32_0 : i32, i32
  }
  func.func @transform_6(%arg0: i32, %arg1: i32) -> (i32, i32) {
    %c0_i32 = arith.constant 0 : i32
    %c0_i32_0 = arith.constant 0 : i32
    %c0_i32_1 = arith.constant 0 : i32
    return %c0_i32, %c0_i32_0 : i32, i32
  }
  func.func @transform_7(%arg0: i32, %arg1: i32) -> (i32, i32) {
    %c0_i32 = arith.constant 0 : i32
    %c0_i32_0 = arith.constant 0 : i32
    return %arg0, %c0_i32 : i32, i32
  }
}

</mosaic_0001>

<bundles_post_ra>
// kernel: tpu_custom_call.1
= control target key start
LH: loop header
LB: loop body
LE: loop exit
PB: predicated region body
PF: predicated region fallthrough
CT: control target
= control target key end

     0   :  { %12 = vsyncpa [#allocation4], 0  ;;  %s2237_s0 = inlined_call_operand.hbm [shape: f32[2,8,256], index: 0, kind: input, shape index: {}]   ;;  %s2238_s1 = inlined_call_operand.hbm [shape: f32[8,256], index: 1, kind: input, shape index: {}]   ;;  %s2239_s2 = inlined_call_operand.vmem [shape: f32[1,256], index: 2, kind: input, shape index: {}]   ;;  %s2240_s3 = inlined_call_operand.hbm [shape: f32[256,128], index: 3, kind: input, shape index: {}]   ;;  %s2241_s4 = inlined_call_operand.vmem [shape: f32[1,128], index: 4, kind: input, shape index: {}]   ;;  %s2242_s5 = inlined_call_operand.hbm [shape: f32[128,128], index: 5, kind: input, shape index: {}]   ;;  %s2243_s6 = inlined_call_operand.vmem [shape: f32[1,128], index: 6, kind: input, shape index: {}]   ;;  %s2244_s7 = inlined_call_operand.hbm [shape: f32[2,128], index: 7, kind: output, shape index: {}]  }
   0x1   :  { %13 = vsyncpa [#allocation7], 0 }
   0x2   :  { %14 = vsyncpa [#allocation10], 0 }
   0x3   :  { %15 = vsyncpa [#allocation5], 0  ;;  %s1825_s24 = smov [#allocation6]   ;;  %s1826_s26 = smov [#allocation3]  }
   0x4   :  { %s34_s25 = sshll.u32 %s1825_s24, 4  ;;  %s21_s27 = sshll.u32 %s1826_s26, 4  ;;  %s35_s25 = int_to_ptr.vmem [resolvable:$true] %s34_s25  ;;  %s1878_s27 = int_to_ptr.vmem [resolvable:$true] %s21_s27 }
   0x5   :  { %s1707_s30 = scalar_lea.hbm %s2238_s1, 256 }
   0x6   :  { %p1708_p0 = scmp.ne.s32.totalorder %s2238_s1, %s1707_s30  ;;  %p1711_p1 = scmp.lt.u32.totalorder %s1707_s30, %s2238_s1 }
   0x8   :  { %p1713_p2 = pnand %p1711_p1, %p1708_p0 }
   0xa   :  { %1716 = shalt.err (!%p1713_p2)
}
   0xb   :  { %s1717_s12 = scalar_lea.vmem %s35_s25, 256  ;;  %p1722_p4 = scmp.lt.s32.totalorder %s35_s25, %s35_s25 }
   0xc   :  { %p1718_p3 = scmp.ne.s32.totalorder %s35_s25, %s1717_s12  ;;  %p1723_p5 = scmp.lt.s32.totalorder %s1717_s12, %s1717_s12 }
   0xe   :  { %p1724_p6 = por %p1723_p5, %p1722_p4 }
  0x10   :  { %p1725_p7 = pnand %p1724_p6, %p1718_p3 }
  0x12   :  { %1728 = shalt.err (!%p1725_p7)
}
  0x13   :  { %37 = dma.hbm_to_vmem [thread:$0]  %s2238_s1, 256, %s35_s25, [#allocation7]  }
  0x14   :  { %s1729_s17 = scalar_lea.hbm %s2237_s0, 512 }
  0x15   :  { %p1730_p8 = scmp.ne.s32.totalorder %s2237_s0, %s1729_s17  ;;  %p1733_p9 = scmp.lt.u32.totalorder %s1729_s17, %s2237_s0 }
  0x17   :  { %p1735_p10 = pnand %p1733_p9, %p1730_p8 }
  0x19   :  { %1738 = shalt.err (!%p1735_p10)
}
  0x1a   :  { %s1739_s22 = scalar_lea.vmem %s1878_s27, 512  ;;  %p1744_p12 = scmp.lt.s32.totalorder %s1878_s27, %s1878_s27 }
  0x1b   :  { %p1740_p11 = scmp.ne.s32.totalorder %s1878_s27, %s1739_s22  ;;  %p1745_p13 = scmp.lt.s32.totalorder %s1739_s22, %s1739_s22 }
  0x1d   :  { %p1746_p0 = por %p1745_p13, %p1744_p12 }
  0x1f   :  { %p1747_p1 = pnand %p1746_p0, %p1740_p11 }
  0x21   :  { %1750 = shalt.err (!%p1747_p1)
}
  0x22   :  { %s1827_s1 = smov 256   ;;  %s1828_s23 = smov 16  }
  0x23   :  { %27 = dma.hbm_to_vmem [thread:$0]  %s2237_s0, 512, %s1878_s27, [#allocation4], %s1827_s1, %s1827_s1, %s1828_s23  }
  0x24   :  { %s1829_s26 = smov [#allocation8]   ;;  %s1751_s8 = scalar_lea.hbm %s2240_s3, 4096 }
  0x25   :  { %s45_s28 = sshll.u32 %s1829_s26, 4  ;;  %p1752_p2 = scmp.ne.s32.totalorder %s2240_s3, %s1751_s8  ;;  %s46_s28 = int_to_ptr.vmem [resolvable:$true] %s45_s28 }
  0x26   :  { %p1755_p3 = scmp.lt.u32.totalorder %s1751_s8, %s2240_s3 }
  0x28   :  { %p1757_p4 = pnand %p1755_p3, %p1752_p2 }
  0x2a   :  { %1760 = shalt.err (!%p1757_p4)
}
  0x2b   :  { %s1761_s13 = scalar_lea.vmem %s46_s28, 4096  ;;  %p1766_p6 = scmp.lt.s32.totalorder %s46_s28, %s46_s28 }
  0x2c   :  { %p1762_p5 = scmp.ne.s32.totalorder %s46_s28, %s1761_s13  ;;  %p1767_p7 = scmp.lt.s32.totalorder %s1761_s13, %s1761_s13 }
  0x2e   :  { %p1768_p8 = por %p1767_p7, %p1766_p6 }
  0x30   :  { %p1769_p9 = pnand %p1768_p8, %p1762_p5 }
  0x32   :  { %1772 = shalt.err (!%p1769_p9)
}
  0x33   :  { %s1830_s0 = smov 128   ;;  %s1831_s27 = smov 8  }
  0x34   :  { %51 = dma.hbm_to_vmem [thread:$0]  %s2240_s3, 4096, %s46_s28, [#allocation7], %s1830_s0, %s1830_s0, %s1831_s27  }
  0x35   :  { %s1832_s16 = smov [#allocation9]   ;;  %s1773_s20 = scalar_lea.hbm %s2242_s5, 2048 }
  0x36   :  { %s59_s17 = sshll.u32 %s1832_s16, 4  ;;  %p1774_p10 = scmp.ne.s32.totalorder %s2242_s5, %s1773_s20  ;;  %s60_s17 = int_to_ptr.vmem [resolvable:$true] %s59_s17 }
  0x37   :  { %p1777_p11 = scmp.lt.u32.totalorder %s1773_s20, %s2242_s5 }
  0x39   :  { %p1779_p12 = pnand %p1777_p11, %p1774_p10 }
  0x3b   :  { %1782 = shalt.err (!%p1779_p12)
}
  0x3c   :  { %s1783_s24 = scalar_lea.vmem %s60_s17, 2048  ;;  %p1788_p0 = scmp.lt.s32.totalorder %s60_s17, %s60_s17 }
  0x3d   :  { %p1784_p13 = scmp.ne.s32.totalorder %s60_s17, %s1783_s24  ;;  %p1789_p1 = scmp.lt.s32.totalorder %s1783_s24, %s1783_s24 }
  0x3f   :  { %p1790_p2 = por %p1789_p1, %p1788_p0 }
  0x41   :  { %p1791_p3 = pnand %p1790_p2, %p1784_p13 }
  0x43   :  { %1794 = shalt.err (!%p1791_p3)
}
  0x44   :  { %65 = dma.hbm_to_vmem [thread:$0]  %s2242_s5, 2048, %s60_s17, [#allocation10], %s1830_s0, %s1830_s0, %s1831_s27  }
  0x45   :  { %1817 = dma.done.wait [#allocation4], 512  }
  0x46   :  { %1818 = vsyncadd [#allocation4], 4294966784 }
  0x47   :  { %1819 = dma.done.wait [#allocation7], 4352  }
  0x48   :  { %1820 = vsyncadd [#allocation7], 4294962944 }
  0x49   :  { %1821 = dma.done.wait [#allocation10], 2048  }
  0x4a   :  { %1822 = vsyncadd [#allocation10], 4294965248  ;;  %v1833_v0 = vmov 0.0   ;;  %v85_v1 = vld [vmem:[#allocation3] sm:$0xff]  ;;  %v86_v2 = vld [vmem:[#allocation3 + $0x8] sm:$0xff]  ;;  %vm165_vm0 = vcmask 64512  }
  0x4b   :  { %326 = vmatprep.mubr.f32.mxu0 %v1833_v0  ;;  %84 = vst [vmem:[#allocation2] sm:$0xf] %v1833_v0  ;;  %884 = vmatprep.mubr.f32.mxu1 %v1833_v0  ;;  %v88_v3 = vld [vmem:[#allocation6 + $0x8] sm:$0xff]  ;;  %v87_v4 = vld [vmem:[#allocation6] sm:$0xff]  ;;  %v658_v5 = vld [vmem:[#allocation3 + $0x10] sm:$0xff]  ;;  %vm1216_vm1 = vcmask 1040384  }
  0x4c   :  { %101 = vxpose.xlu0.b32.start.end [1/1] (short) %v85_v1, 128  ;;  %133 = vxpose.xlu1.b32.start.end [1/1] (short) %v86_v2, 128  ;;  %v659_v6 = vld [vmem:[#allocation3 + $0x18] sm:$0xff]  ;;  %vm1836_vm2 = vmmov 0   ;;  %vm1450_vm3 = vcmask 1041408  }
  0x4d   :  { %262 = vmatprep.subr.mxu0 %v88_v3  ;;  %820 = vmatprep.subr.mxu1 %v88_v3 }
  0x4e   :  { %263 = vmatpush1.msra.mxu0 %v87_v4  ;;  %821 = vmatpush1.msra.mxu1 %v87_v4 }
  0x89   :  { %660 = vxpose.xlu0.b32.start.end [1/1] (short) %v658_v5, 128  ;;  %692 = vxpose.xlu1.b32.start.end [1/1] (short) %v659_v6, 128 }
  0xcc   :  { %v117_v7 = vpop.trf.xlu0  ;;  %v149_v8 = vpop.trf.xlu1 }
  0xcd   :  { %1480 = vmatmul.mubr.msk.f32.vlgmr.msra.gmra.mrb[0].mxu0 %vm165_vm0, %v117_v7 }
  0xce   :  { %332 = vmatprep.mubr.f32.mxu0 %v1833_v0 }
  0xd0   :  { %v118_v9 = vpop.trf.xlu0  ;;  %v150_v10 = vpop.trf.xlu1 }
  0xd1   :  { %1481 = vmatmul.mubr.msk.f32.gmra.mrb[2].mxu0 %vm165_vm0, %v118_v9  ;;  %v1253_v9 = vld [vmem:[#allocation8 + $0x88] sm:$0xff] }
  0xd2   :  { %338 = vmatprep.mubr.f32.mxu0 %v1833_v0 }
  0xd4   :  { %v119_v11 = vpop.trf.xlu0  ;;  %v151_v13 = vpop.trf.xlu1 }
  0xd5   :  { %1482 = vmatmul.mubr.msk.f32.gmra.mrb[4].mxu0 %vm165_vm0, %v119_v11 }
  0xd6   :  { %344 = vmatprep.mubr.f32.mxu0 %v1833_v0 }
  0xd8   :  { %v120_v12 = vpop.trf.xlu0  ;;  %v152_v15 = vpop.trf.xlu1 }
  0xd9   :  { %1483 = vmatmul.mubr.msk.f32.gmra.mrb[6].mxu0 %vm165_vm0, %v120_v12  ;;  %v1237_v12 = vld [vmem:[#allocation8 + $0x8] sm:$0xff] }
  0xda   :  { %350 = vmatprep.mubr.f32.mxu0 %v1833_v0 }
  0xdc   :  { %v121_v14 = vpop.trf.xlu0  ;;  %v153_v18 = vpop.trf.xlu1 }
  0xdd   :  { %1484 = vmatmul.mubr.msk.f32.gmra.mrb[8].mxu0 %vm165_vm0, %v121_v14  ;;  %v91_v14 = vlaneseq }
  0xde   :  { %356 = vmatprep.mubr.f32.mxu0 %v1833_v0 }
  0xe0   :  { %v122_v16 = vpop.trf.xlu0  ;;  %v154_v20 = vpop.trf.xlu1 }
  0xe1   :  { %1485 = vmatmul.mubr.msk.f32.gmra.mrb[10].mxu0 %vm165_vm0, %v122_v16  ;;  %v1255_v16 = vld [vmem:[#allocation8 + $0x98] sm:$0xff] }
  0xe2   :  { %362 = vmatprep.mubr.f32.mxu0 %v1833_v0 }
  0xe4   :  { %v123_v17 = vpop.trf.xlu0  ;;  %v155_v23 = vpop.trf.xlu1 }
  0xe5   :  { %1486 = vmatmul.mubr.msk.f32.gmra.mrb[12].mxu0 %vm165_vm0, %v123_v17  ;;  %v1238_v17 = vld [vmem:[#allocation8 + $0x10] sm:$0xff] }
  0xe6   :  { %368 = vmatprep.mubr.f32.mxu0 %v1833_v0 }
  0xe8   :  { %v124_v19 = vpop.trf.xlu0  ;;  %v156_v25 = vpop.trf.xlu1 }
  0xe9   :  { %1487 = vmatmul.mubr.msk.f32.gmra.mrb[14].mxu0 %vm165_vm0, %v124_v19 }
  0xea   :  { %374 = vmatprep.mubr.f32.mxu0 %v1833_v0 }
  0xec   :  { %v125_v21 = vpop.trf.xlu0  ;;  %v157_v28 = vpop.trf.xlu1 }
  0xed   :  { %1488 = vmatmul.mubr.msk.f32.gmra.mrb[16].mxu0 %vm165_vm0, %v125_v21 }
  0xee   :  { %380 = vmatprep.mubr.f32.mxu0 %v1833_v0 }
  0xf0   :  { %v126_v22 = vpop.trf.xlu0  ;;  %v158_v30 = vpop.trf.xlu1 }
  0xf1   :  { %1489 = vmatmul.mubr.msk.f32.gmra.mrb[18].mxu0 %vm165_vm0, %v126_v22 }
  0xf2   :  { %386 = vmatprep.mubr.f32.mxu0 %v1833_v0 }
  0xf4   :  { %v127_v24 = vpop.trf.xlu0  ;;  %v159_v33 = vpop.trf.xlu1 }
  0xf5   :  { %1490 = vmatmul.mubr.msk.f32.gmra.mrb[20].mxu0 %vm165_vm0, %v127_v24 }
  0xf6   :  { %392 = vmatprep.mubr.f32.mxu0 %v1833_v0 }
  0xf8   :  { %v128_v26 = vpop.trf.xlu0  ;;  %v160_v35 = vpop.trf.xlu1 }
  0xf9   :  { %1491 = vmatmul.mubr.msk.f32.gmra.mrb[22].mxu0 %vm165_vm0, %v128_v26 }
  0xfa   :  { %398 = vmatprep.mubr.f32.mxu0 %v1833_v0 }
  0xfc   :  { %v129_v27 = vpop.trf.xlu0  ;;  %v161_v38 = vpop.trf.xlu1 }
  0xfd   :  { %1492 = vmatmul.mubr.msk.f32.gmra.mrb[24].mxu0 %vm165_vm0, %v129_v27 }
  0xfe   :  { %404 = vmatprep.mubr.f32.mxu0 %v1833_v0 }
 0x100   :  { %v130_v29 = vpop.trf.xlu0  ;;  %v162_v40 = vpop.trf.xlu1 }
 0x101   :  { %1493 = vmatmul.mubr.msk.f32.gmra.mrb[26].mxu0 %vm165_vm0, %v130_v29 }
 0x102   :  { %410 = vmatprep.mubr.f32.mxu0 %v1833_v0 }
 0x104   :  { %v131_v31 = vpop.trf.xlu0  ;;  %v163_v43 = vpop.trf.xlu1 }
 0x105   :  { %1494 = vmatmul.mubr.msk.f32.gmra.mrb[28].mxu0 %vm165_vm0, %v131_v31 }
 0x106   :  { %416 = vmatprep.mubr.f32.mxu0 %v1833_v0 }
 0x108   :  { %v132_v32 = vpop.trf.xlu0  ;;  %v164_v45 = vpop.trf.xlu1 }
 0x109   :  { %1495 = vmatmul.mubr.msk.f32.gmra.mrb[30].mxu0 %vm165_vm0, %v132_v32 }
 0x10a   :  { %422 = vmatprep.mubr.f32.mxu0 %v1833_v0 }
 0x10c   :  { %v676_v34 = vpop.trf.xlu0  ;;  %v708_v48 = vpop.trf.xlu1 }
 0x10d   :  { %1496 = vmatmul.mubr.msk.f32.gmra.mrb[32].mxu0 %vm165_vm0, %v149_v8  ;;  %1512 = vmatmul.mubr.msk.f32.vlgmr.msra.gmra.mrb[0].mxu1 %vm165_vm0, %v676_v34  ;;  %v1252_v8 = vld [vmem:[#allocation8 + $0x80] sm:$0xff] }
 0x10e   :  { %428 = vmatprep.mubr.f32.mxu0 %v1833_v0  ;;  %890 = vmatprep.mubr.f32.mxu1 %v1833_v0  ;;  %v1634_v11 = vpack.c.bf16 %v1253_v9, %v1252_v8 }
 0x110   :  { %v677_v36 = vpop.trf.xlu0  ;;  %v709_v50 = vpop.trf.xlu1  ;;  %1635 = vmatprep.subr.bf16.mxu0 %v1634_v11 }
 0x111   :  { %1497 = vmatmul.mubr.msk.f32.gmra.mrb[34].mxu0 %vm165_vm0, %v150_v10  ;;  %1513 = vmatmul.mubr.msk.f32.gmra.mrb[2].mxu1 %vm165_vm0, %v677_v36  ;;  %v1236_v10 = vld [vmem:[#allocation8] sm:$0xff] }
 0x112   :  { %434 = vmatprep.mubr.f32.mxu0 %v1833_v0  ;;  %896 = vmatprep.mubr.f32.mxu1 %v1833_v0 }
 0x114   :  { %v678_v37 = vpop.trf.xlu0  ;;  %v710_v53 = vpop.trf.xlu1 }
 0x115   :  { %1498 = vmatmul.mubr.msk.f32.gmra.mrb[36].mxu0 %vm165_vm0, %v151_v13  ;;  %1514 = vmatmul.mubr.msk.f32.gmra.mrb[4].mxu1 %vm165_vm0, %v678_v37  ;;  %v1636_v13 = vpack.c.bf16 %v1237_v12, %v1236_v10  ;;  %v1258_v12 = vld [vmem:[#allocation8 + $0xb0] sm:$0xff] }
 0x116   :  { %440 = vmatprep.mubr.f32.mxu0 %v1833_v0  ;;  %902 = vmatprep.mubr.f32.mxu1 %v1833_v0 }
 0x117   :  { %1637 = vmatpush3.bf16.msra.mxu0 %v1636_v13  ;;  %v1259_v13 = vld [vmem:[#allocation8 + $0xb8] sm:$0xff] }
 0x118   :  { %v679_v39 = vpop.trf.xlu0  ;;  %v711_v55 = vpop.trf.xlu1 }
 0x119   :  { %1499 = vmatmul.mubr.msk.f32.gmra.mrb[38].mxu0 %vm165_vm0, %v152_v15  ;;  %1515 = vmatmul.mubr.msk.f32.gmra.mrb[6].mxu1 %vm165_vm0, %v679_v39  ;;  %v1254_v15 = vld [vmem:[#allocation8 + $0x90] sm:$0xff] }
 0x11a   :  { %446 = vmatprep.mubr.f32.mxu0 %v1833_v0  ;;  %908 = vmatprep.mubr.f32.mxu1 %v1833_v0  ;;  %v1638_v19 = vpack.c.bf16 %v1255_v16, %v1254_v15  ;;  %v1646_v16 = vpack.c.bf16 %v1259_v13, %v1258_v12 }
 0x11c   :  { %v680_v41 = vpop.trf.xlu0  ;;  %v712_v58 = vpop.trf.xlu1  ;;  %1639 = vmatprep.subr.bf16.mxu0 %v1638_v19 }
 0x11d   :  { %1500 = vmatmul.mubr.msk.f32.gmra.mrb[40].mxu0 %vm165_vm0, %v153_v18  ;;  %1516 = vmatmul.mubr.msk.f32.gmra.mrb[8].mxu1 %vm165_vm0, %v680_v41  ;;  %v2062_v18 = vshrl.u32 %v91_v14, 7  ;;  %v1242_v14 = vld [vmem:[#allocation8 + $0x30] sm:$0xff] }
 0x11e   :  { %452 = vmatprep.mubr.f32.mxu0 %v1833_v0  ;;  %914 = vmatprep.mubr.f32.mxu1 %v1833_v0 }
 0x11f   :  { %v93_v22 = vsub.s32 0, %v2062_v18  ;;  %v97_v24 = vsub.s32 1, %v2062_v18 }
 0x120   :  { %v681_v42 = vpop.trf.xlu0  ;;  %v713_v60 = vpop.trf.xlu1 }
 0x121   :  { %1501 = vmatmul.mubr.msk.f32.gmra.mrb[42].mxu0 %vm165_vm0, %v154_v20  ;;  %1517 = vmatmul.mubr.msk.f32.gmra.mrb[10].mxu1 %vm165_vm0, %v681_v42  ;;  %v1239_v20 = vld [vmem:[#allocation8 + $0x18] sm:$0xff] }
 0x122   :  { %458 = vmatprep.mubr.f32.mxu0 %v1833_v0  ;;  %920 = vmatprep.mubr.f32.mxu1 %v1833_v0  ;;  %v1640_v21 = vpack.c.bf16 %v1239_v20, %v1238_v17  ;;  %v1243_v17 = vld [vmem:[#allocation8 + $0x38] sm:$0xff] }
 0x124   :  { %v682_v44 = vpop.trf.xlu0  ;;  %v714_v61 = vpop.trf.xlu1  ;;  %1641 = vmatpush3.bf16.msra.mxu0 %v1640_v21  ;;  %v1648_v21 = vpack.c.bf16 %v1243_v17, %v1242_v14 }
 0x125   :  { %1502 = vmatmul.mubr.msk.f32.gmra.mrb[44].mxu0 %vm165_vm0, %v155_v23  ;;  %1518 = vmatmul.mubr.msk.f32.gmra.mrb[12].mxu1 %vm165_vm0, %v682_v44  ;;  %v89_v23 = vld [vmem:[%s2239_s2] sm:$0x3] }
 0x126   :  { %464 = vmatprep.mubr.f32.mxu0 %v1833_v0  ;;  %926 = vmatprep.mubr.f32.mxu1 %v1833_v0  ;;  %v2071_v27 = vrot.slane %v89_v23, %v97_v24 }
 0x128   :  { %v683_v46 = vpop.trf.xlu0  ;;  %v715_v62 = vpop.trf.xlu1 }
 0x129   :  { %1503 = vmatmul.mubr.msk.f32.gmra.mrb[46].mxu0 %vm165_vm0, %v156_v25  ;;  %1519 = vmatmul.mubr.msk.f32.gmra.mrb[14].mxu1 %vm165_vm0, %v683_v46  ;;  %v2069_v25 = vrot.slane %v89_v23, %v93_v22 }
 0x12a   :  { %470 = vmatprep.mubr.f32.mxu0 %v1833_v0  ;;  %932 = vmatprep.mubr.f32.mxu1 %v1833_v0 }
 0x12c   :  { %v684_v47 = vpop.trf.xlu0  ;;  %v716_v63 = vpop.trf.xlu1 }
 0x12d   :  { %1504 = vmatmul.mubr.msk.f32.gmra.mrb[48].mxu0 %vm165_vm0, %v157_v28  ;;  %1520 = vmatmul.mubr.msk.f32.gmra.mrb[16].mxu1 %vm165_vm0, %v684_v47 }
 0x12e   :  { %476 = vmatprep.mubr.f32.mxu0 %v1833_v0  ;;  %938 = vmatprep.mubr.f32.mxu1 %v1833_v0 }
 0x130   :  { %v685_v49 = vpop.trf.xlu0  ;;  %v717_v1 = vpop.trf.xlu1 }
 0x131   :  { %1505 = vmatmul.mubr.msk.f32.gmra.mrb[50].mxu0 %vm165_vm0, %v158_v30  ;;  %1521 = vmatmul.mubr.msk.f32.gmra.mrb[18].mxu1 %vm165_vm0, %v685_v49 }
 0x132   :  { %482 = vmatprep.mubr.f32.mxu0 %v1833_v0  ;;  %944 = vmatprep.mubr.f32.mxu1 %v1833_v0 }
 0x134   :  { %v686_v51 = vpop.trf.xlu0  ;;  %v718_v2 = vpop.trf.xlu1 }
 0x135   :  { %1506 = vmatmul.mubr.msk.f32.gmra.mrb[52].mxu0 %vm165_vm0, %v159_v33  ;;  %1522 = vmatmul.mubr.msk.f32.gmra.mrb[20].mxu1 %vm165_vm0, %v686_v51 }
 0x136   :  { %488 = vmatprep.mubr.f32.mxu0 %v1833_v0  ;;  %950 = vmatprep.mubr.f32.mxu1 %v1833_v0 }
 0x138   :  { %v687_v52 = vpop.trf.xlu0  ;;  %v719_v3 = vpop.trf.xlu1 }
 0x139   :  { %1507 = vmatmul.mubr.msk.f32.gmra.mrb[54].mxu0 %vm165_vm0, %v160_v35  ;;  %1523 = vmatmul.mubr.msk.f32.gmra.mrb[22].mxu1 %vm165_vm0, %v687_v52 }
 0x13a   :  { %494 = vmatprep.mubr.f32.mxu0 %v1833_v0  ;;  %956 = vmatprep.mubr.f32.mxu1 %v1833_v0 }
 0x13c   :  { %v688_v54 = vpop.trf.xlu0  ;;  %v720_v4 = vpop.trf.xlu1 }
 0x13d   :  { %1508 = vmatmul.mubr.msk.f32.gmra.mrb[56].mxu0 %vm165_vm0, %v161_v38  ;;  %1524 = vmatmul.mubr.msk.f32.gmra.mrb[24].mxu1 %vm165_vm0, %v688_v54  ;;  %v1257_v54 = vld [vmem:[#allocation8 + $0xa8] sm:$0xff] }
 0x13e   :  { %500 = vmatprep.mubr.f32.mxu0 %v1833_v0  ;;  %962 = vmatprep.mubr.f32.mxu1 %v1833_v0 }
 0x140   :  { %v689_v56 = vpop.trf.xlu0  ;;  %v721_v5 = vpop.trf.xlu1 }
 0x141   :  { %1509 = vmatmul.mubr.msk.f32.gmra.mrb[58].mxu0 %vm165_vm0, %v162_v40  ;;  %1525 = vmatmul.mubr.msk.f32.gmra.mrb[26].mxu1 %vm165_vm0, %v689_v56 }
 0x142   :  { %506 = vmatprep.mubr.f32.mxu0 %v1833_v0  ;;  %968 = vmatprep.mubr.f32.mxu1 %v1833_v0 }
 0x144   :  { %v690_v57 = vpop.trf.xlu0  ;;  %v722_v6 = vpop.trf.xlu1 }
 0x145   :  { %1510 = vmatmul.mubr.msk.f32.gmra.mrb[60].mxu0 %vm165_vm0, %v163_v43  ;;  %1526 = vmatmul.mubr.msk.f32.gmra.mrb[28].mxu1 %vm165_vm0, %v690_v57 }
 0x146   :  { %512 = vmatprep.mubr.f32.mxu0 %v1833_v0  ;;  %974 = vmatprep.mubr.f32.mxu1 %v1833_v0 }
 0x148   :  { %v691_v59 = vpop.trf.xlu0  ;;  %v723_v7 = vpop.trf.xlu1 }
 0x149   :  { %1511 = vmatmul.mubr.msk.f32.gmra.mrb[62].mxu0 %vm165_vm0, %v164_v45  ;;  %1527 = vmatmul.mubr.msk.f32.gmra.mrb[30].mxu1 %vm165_vm0, %v691_v59 }
 0x14a   :  { %980 = vmatprep.mubr.f32.mxu1 %v1833_v0 }
 0x14d   :  { %1528 = vmatmul.mubr.msk.f32.gmra.mrb[32].mxu1 %vm165_vm0, %v708_v48 }
 0x14e   :  { %986 = vmatprep.mubr.f32.mxu1 %v1833_v0 }
 0x151   :  { %1529 = vmatmul.mubr.msk.f32.gmra.mrb[34].mxu1 %vm165_vm0, %v709_v50 }
 0x152   :  { %992 = vmatprep.mubr.f32.mxu1 %v1833_v0 }
 0x155   :  { %1530 = vmatmul.mubr.msk.f32.gmra.mrb[36].mxu1 %vm165_vm0, %v710_v53  ;;  %v1256_v53 = vld [vmem:[#allocation8 + $0xa0] sm:$0xff] }
 0x156   :  { %998 = vmatprep.mubr.f32.mxu1 %v1833_v0  ;;  %v1642_v57 = vpack.c.bf16 %v1257_v54, %v1256_v53  ;;  %v1260_v53 = vld [vmem:[#allocation8 + $0xc0] sm:$0xff]  ;;  %v1261_v54 = vld [vmem:[#allocation8 + $0xc8] sm:$0xff] }
 0x158   :  { %1643 = vmatprep.subr.bf16.mxu0 %v1642_v57  ;;  %v1650_v57 = vpack.c.bf16 %v1261_v54, %v1260_v53 }
 0x159   :  { %1531 = vmatmul.mubr.msk.f32.gmra.mrb[38].mxu1 %vm165_vm0, %v711_v55  ;;  %v1240_v55 = vld [vmem:[#allocation8 + $0x20] sm:$0xff] }
 0x15a   :  { %1004 = vmatprep.mubr.f32.mxu1 %v1833_v0 }
 0x15d   :  { %1532 = vmatmul.mubr.msk.f32.gmra.mrb[40].mxu1 %vm165_vm0, %v712_v58  ;;  %v1241_v58 = vld [vmem:[#allocation8 + $0x28] sm:$0xff] }
 0x15e   :  { %1010 = vmatprep.mubr.f32.mxu1 %v1833_v0 }
 0x161   :  { %1533 = vmatmul.mubr.msk.f32.gmra.mrb[42].mxu1 %vm165_vm0, %v713_v60 }
 0x162   :  { %1016 = vmatprep.mubr.f32.mxu1 %v1833_v0 }
 0x165   :  { %1534 = vmatmul.mubr.msk.f32.gmra.mrb[44].mxu1 %vm165_vm0, %v714_v61  ;;  %v1644_v61 = vpack.c.bf16 %v1241_v58, %v1240_v55  ;;  %v1244_v55 = vld [vmem:[#allocation8 + $0x40] sm:$0xff]  ;;  %v1245_v58 = vld [vmem:[#allocation8 + $0x48] sm:$0xff] }
 0x166   :  { %1022 = vmatprep.mubr.f32.mxu1 %v1833_v0 }
 0x167   :  { %1645 = vmatpush3.bf16.msra.mxu0 %v1644_v61  ;;  %v1652_v61 = vpack.c.bf16 %v1245_v58, %v1244_v55 }
 0x168   :  { %1647 = vmatprep.subr.bf16.mxu0 %v1646_v16 }
 0x169   :  { %1535 = vmatmul.mubr.msk.f32.gmra.mrb[46].mxu1 %vm165_vm0, %v715_v62 }
 0x16a   :  { %1028 = vmatprep.mubr.f32.mxu1 %v1833_v0 }
 0x16b   :  { %1649 = vmatpush3.bf16.msra.mxu0 %v1648_v21 }
 0x16c   :  { %1651 = vmatprep.subr.bf16.mxu0 %v1650_v57 }
 0x16d   :  { %1536 = vmatmul.mubr.msk.f32.gmra.mrb[48].mxu1 %vm165_vm0, %v716_v63 }
 0x16e   :  { %1034 = vmatprep.mubr.f32.mxu1 %v1833_v0 }
 0x16f   :  { %1653 = vmatpush3.bf16.msra.mxu0 %v1652_v61 }
 0x171   :  { %1537 = vmatmul.mubr.msk.f32.gmra.mrb[50].mxu1 %vm165_vm0, %v717_v1 }
 0x172   :  { %1040 = vmatprep.mubr.f32.mxu1 %v1833_v0 }
 0x175   :  { %1538 = vmatmul.mubr.msk.f32.gmra.mrb[52].mxu1 %vm165_vm0, %v718_v2 }
 0x176   :  { %1046 = vmatprep.mubr.f32.mxu1 %v1833_v0 }
 0x179   :  { %1539 = vmatmul.mubr.msk.f32.gmra.mrb[54].mxu1 %vm165_vm0, %v719_v3 }
 0x17a   :  { %1052 = vmatprep.mubr.f32.mxu1 %v1833_v0 }
 0x17d   :  { %1540 = vmatmul.mubr.msk.f32.gmra.mrb[56].mxu1 %vm165_vm0, %v720_v4 }
 0x17e   :  { %1058 = vmatprep.mubr.f32.mxu1 %v1833_v0 }
 0x181   :  { %1541 = vmatmul.mubr.msk.f32.gmra.mrb[58].mxu1 %vm165_vm0, %v721_v5 }
 0x182   :  { %1064 = vmatprep.mubr.f32.mxu1 %v1833_v0 }
 0x185   :  { %1542 = vmatmul.mubr.msk.f32.gmra.mrb[60].mxu1 %vm165_vm0, %v722_v6 }
 0x186   :  { %1070 = vmatprep.mubr.f32.mxu1 %v1833_v0 }
 0x189   :  { %1543 = vmatmul.mubr.msk.f32.gmra.mrb[62].mxu1 %vm165_vm0, %v723_v7 }
 0x18a   :  { %1631 = vmatprep.mubr.msk.f32.mxu1 %vm1836_vm2, %v1833_v0 }
 0x1a0   :  { %v328_v26 = vpop.f32.mrb[0].mxu0 }
 0x1a1   :  { %v330_v28 = vpop.f32.mrb[1].mxu0  ;;  %v329_v29 = vadd.f32 %v328_v26, %v2069_v25 }
 0x1a2   :  { %v331_v30 = vadd.f32 %v330_v28, %v2071_v27 }
 0x1a3   :  { %v519_v35 = vmax.f32 %v329_v29, 0.0 }
 0x1a4   :  { %v334_v31 = vpop.f32.mrb[2].mxu0  ;;  %v520_v37 = vmax.f32 %v331_v30, 0.0 }
 0x1a5   :  { %v335_v32 = vadd.f32 %v334_v31, %v2069_v25  ;;  %v336_v33 = vpop.f32.mrb[3].mxu0 }
 0x1a6   :  { %v337_v34 = vadd.f32 %v336_v33, %v2071_v27 }
 0x1a7   :  { %v521_v36 = vmax.f32 %v335_v32, 0.0 }
 0x1a8   :  { %v522_v38 = vmax.f32 %v337_v34, 0.0  ;;  %v340_v39 = vpop.f32.mrb[4].mxu0 }
 0x1a9   :  { %v583_v40 = vadd.f32 %v521_v36, %v519_v35  ;;  %v341_v41 = vadd.f32 %v340_v39, %v2069_v25  ;;  %v342_v42 = vpop.f32.mrb[5].mxu0 }
 0x1aa   :  { %v620_v43 = vadd.f32 %v522_v38, %v520_v37  ;;  %v343_v44 = vadd.f32 %v342_v42, %v2071_v27 }
 0x1ab   :  { %v523_v45 = vmax.f32 %v341_v41, 0.0 }
 0x1ac   :  { %v524_v46 = vmax.f32 %v343_v44, 0.0  ;;  %v346_v47 = vpop.f32.mrb[6].mxu0 }
 0x1ad   :  { %v584_v48 = vadd.f32 %v583_v40, %v523_v45  ;;  %v347_v49 = vadd.f32 %v346_v47, %v2069_v25  ;;  %v348_v50 = vpop.f32.mrb[7].mxu0 }
 0x1ae   :  { %v621_v51 = vadd.f32 %v620_v43, %v524_v46  ;;  %v349_v52 = vadd.f32 %v348_v50, %v2071_v27 }
 0x1af   :  { %v525_v56 = vmax.f32 %v347_v49, 0.0 }
 0x1b0   :  { %v526_v59 = vmax.f32 %v349_v52, 0.0  ;;  %v352_v60 = vpop.f32.mrb[8].mxu0 }
 0x1b1   :  { %v585_v62 = vadd.f32 %v584_v48, %v525_v56  ;;  %v353_v63 = vadd.f32 %v352_v60, %v2069_v25  ;;  %v354_v1 = vpop.f32.mrb[9].mxu0 }
 0x1b2   :  { %v622_v2 = vadd.f32 %v621_v51, %v526_v59  ;;  %v355_v3 = vadd.f32 %v354_v1, %v2071_v27 }
 0x1b3   :  { %v527_v4 = vmax.f32 %v353_v63, 0.0 }
 0x1b4   :  { %v528_v5 = vmax.f32 %v355_v3, 0.0  ;;  %v358_v6 = vpop.f32.mrb[10].mxu0 }
 0x1b5   :  { %v586_v7 = vadd.f32 %v585_v62, %v527_v4  ;;  %v359_v8 = vadd.f32 %v358_v6, %v2069_v25  ;;  %v360_v9 = vpop.f32.mrb[11].mxu0 }
 0x1b6   :  { %v623_v10 = vadd.f32 %v622_v2, %v528_v5  ;;  %v361_v11 = vadd.f32 %v360_v9, %v2071_v27 }
 0x1b7   :  { %v529_v15 = vmax.f32 %v359_v8, 0.0 }
 0x1b8   :  { %v530_v19 = vmax.f32 %v361_v11, 0.0  ;;  %v364_v20 = vpop.f32.mrb[12].mxu0 }
 0x1b9   :  { %v587_v22 = vadd.f32 %v586_v7, %v529_v15  ;;  %v365_v23 = vadd.f32 %v364_v20, %v2069_v25  ;;  %v366_v24 = vpop.f32.mrb[13].mxu0 }
 0x1ba   :  { %v624_v26 = vadd.f32 %v623_v10, %v530_v19  ;;  %v367_v28 = vadd.f32 %v366_v24, %v2071_v27 }
 0x1bb   :  { %v531_v29 = vmax.f32 %v365_v23, 0.0 }
 0x1bc   :  { %v532_v30 = vmax.f32 %v367_v28, 0.0  ;;  %v370_v31 = vpop.f32.mrb[14].mxu0 }
 0x1bd   :  { %v588_v32 = vadd.f32 %v587_v22, %v531_v29  ;;  %v371_v33 = vadd.f32 %v370_v31, %v2069_v25  ;;  %v372_v34 = vpop.f32.mrb[15].mxu0  ;;  %v1262_v31 = vld [vmem:[#allocation8 + $0xd0] sm:$0xff] }
 0x1be   :  { %v625_v35 = vadd.f32 %v624_v26, %v532_v30  ;;  %v373_v36 = vadd.f32 %v372_v34, %v2071_v27 }
 0x1bf   :  { %v533_v37 = vmax.f32 %v371_v33, 0.0  ;;  %v1246_v33 = vld [vmem:[#allocation8 + $0x50] sm:$0xff] }
 0x1c0   :  { %v534_v38 = vmax.f32 %v373_v36, 0.0  ;;  %v376_v39 = vpop.f32.mrb[16].mxu0  ;;  %v1247_v36 = vld [vmem:[#allocation8 + $0x58] sm:$0xff] }
 0x1c1   :  { %v589_v40 = vadd.f32 %v588_v32, %v533_v37  ;;  %v377_v41 = vadd.f32 %v376_v39, %v2069_v25  ;;  %v378_v42 = vpop.f32.mrb[17].mxu0  ;;  %v1263_v32 = vld [vmem:[#allocation8 + $0xd8] sm:$0xff]  ;;  %v1656_v39 = vpack.c.bf16 %v1247_v36, %v1246_v33 }
 0x1c2   :  { %v626_v43 = vadd.f32 %v625_v35, %v534_v38  ;;  %v379_v44 = vadd.f32 %v378_v42, %v2071_v27  ;;  %v1654_v35 = vpack.c.bf16 %v1263_v32, %v1262_v31 }
 0x1c3   :  { %v535_v45 = vmax.f32 %v377_v41, 0.0 }
 0x1c4   :  { %v536_v46 = vmax.f32 %v379_v44, 0.0  ;;  %v382_v47 = vpop.f32.mrb[18].mxu0  ;;  %1655 = vmatprep.subr.bf16.mxu0 %v1654_v35 }
 0x1c5   :  { %v590_v48 = vadd.f32 %v589_v40, %v535_v45  ;;  %v383_v49 = vadd.f32 %v382_v47, %v2069_v25  ;;  %v384_v50 = vpop.f32.mrb[19].mxu0  ;;  %1657 = vmatpush3.bf16.msra.mxu0 %v1656_v39 }
 0x1c6   :  { %v627_v51 = vadd.f32 %v626_v43, %v536_v46  ;;  %v385_v52 = vadd.f32 %v384_v50, %v2071_v27 }
 0x1c7   :  { %v537_v56 = vmax.f32 %v383_v49, 0.0 }
 0x1c8   :  { %v538_v59 = vmax.f32 %v385_v52, 0.0  ;;  %v388_v60 = vpop.f32.mrb[20].mxu0 }
 0x1c9   :  { %v591_v62 = vadd.f32 %v590_v48, %v537_v56  ;;  %v389_v63 = vadd.f32 %v388_v60, %v2069_v25  ;;  %v390_v1 = vpop.f32.mrb[21].mxu0 }
 0x1ca   :  { %v628_v2 = vadd.f32 %v627_v51, %v538_v59  ;;  %v391_v3 = vadd.f32 %v390_v1, %v2071_v27 }
 0x1cb   :  { %v539_v4 = vmax.f32 %v389_v63, 0.0 }
 0x1cc   :  { %v540_v5 = vmax.f32 %v391_v3, 0.0  ;;  %v394_v6 = vpop.f32.mrb[22].mxu0 }
 0x1cd   :  { %v592_v7 = vadd.f32 %v591_v62, %v539_v4  ;;  %v395_v8 = vadd.f32 %v394_v6, %v2069_v25  ;;  %v396_v9 = vpop.f32.mrb[23].mxu0 }
 0x1ce   :  { %v629_v10 = vadd.f32 %v628_v2, %v540_v5  ;;  %v397_v11 = vadd.f32 %v396_v9, %v2071_v27 }
 0x1cf   :  { %v541_v12 = vmax.f32 %v395_v8, 0.0 }
 0x1d0   :  { %v542_v13 = vmax.f32 %v397_v11, 0.0  ;;  %v400_v14 = vpop.f32.mrb[24].mxu0 }
 0x1d1   :  { %v593_v15 = vadd.f32 %v592_v7, %v541_v12  ;;  %v401_v16 = vadd.f32 %v400_v14, %v2069_v25  ;;  %v402_v17 = vpop.f32.mrb[25].mxu0 }
 0x1d2   :  { %v630_v19 = vadd.f32 %v629_v10, %v542_v13  ;;  %v403_v20 = vadd.f32 %v402_v17, %v2071_v27 }
 0x1d3   :  { %v543_v21 = vmax.f32 %v401_v16, 0.0 }
 0x1d4   :  { %v544_v22 = vmax.f32 %v403_v20, 0.0  ;;  %v406_v23 = vpop.f32.mrb[26].mxu0 }
 0x1d5   :  { %v594_v24 = vadd.f32 %v593_v15, %v543_v21  ;;  %v407_v26 = vadd.f32 %v406_v23, %v2069_v25  ;;  %v408_v28 = vpop.f32.mrb[27].mxu0 }
 0x1d6   :  { %v631_v29 = vadd.f32 %v630_v19, %v544_v22  ;;  %v409_v30 = vadd.f32 %v408_v28, %v2071_v27 }
 0x1d7   :  { %v545_v34 = vmax.f32 %v407_v26, 0.0 }
 0x1d8   :  { %v546_v37 = vmax.f32 %v409_v30, 0.0  ;;  %v412_v38 = vpop.f32.mrb[28].mxu0 }
 0x1d9   :  { %v595_v40 = vadd.f32 %v594_v24, %v545_v34  ;;  %v413_v41 = vadd.f32 %v412_v38, %v2069_v25  ;;  %v414_v42 = vpop.f32.mrb[29].mxu0 }
 0x1da   :  { %v632_v43 = vadd.f32 %v631_v29, %v546_v37  ;;  %v415_v44 = vadd.f32 %v414_v42, %v2071_v27 }
 0x1db   :  { %v547_v45 = vmax.f32 %v413_v41, 0.0 }
 0x1dc   :  { %v548_v46 = vmax.f32 %v415_v44, 0.0  ;;  %v418_v47 = vpop.f32.mrb[30].mxu0 }
 0x1dd   :  { %v596_v48 = vadd.f32 %v595_v40, %v547_v45  ;;  %v419_v49 = vadd.f32 %v418_v47, %v2069_v25  ;;  %v420_v50 = vpop.f32.mrb[31].mxu0 }
 0x1de   :  { %v633_v51 = vadd.f32 %v632_v43, %v548_v46  ;;  %v421_v52 = vadd.f32 %v420_v50, %v2071_v27 }
 0x1df   :  { %v549_v53 = vmax.f32 %v419_v49, 0.0 }
 0x1e0   :  { %v550_v54 = vmax.f32 %v421_v52, 0.0  ;;  %v424_v55 = vpop.f32.mrb[32].mxu0  ;;  %v886_v56 = vpop.f32.mrb[0].mxu1 }
 0x1e1   :  { %v597_v57 = vadd.f32 %v596_v48, %v549_v53  ;;  %v425_v58 = vadd.f32 %v424_v55, %v2069_v25  ;;  %v426_v59 = vpop.f32.mrb[33].mxu0  ;;  %v888_v60 = vpop.f32.mrb[1].mxu1  ;;  %v887_v1 = vadd.f32 %v886_v56, %v2069_v25 }
 0x1e2   :  { %v634_v61 = vadd.f32 %v633_v51, %v550_v54  ;;  %v427_v62 = vadd.f32 %v426_v59, %v2071_v27  ;;  %v889_v3 = vadd.f32 %v888_v60, %v2071_v27 }
 0x1e3   :  { %v551_v63 = vmax.f32 %v425_v58, 0.0  ;;  %v1077_v14 = vmax.f32 %v887_v1, 0.0 }
 0x1e4   :  { %v552_v2 = vmax.f32 %v427_v62, 0.0  ;;  %v430_v4 = vpop.f32.mrb[34].mxu0  ;;  %v892_v5 = vpop.f32.mrb[2].mxu1  ;;  %v1078_v17 = vmax.f32 %v889_v3, 0.0 }
 0x1e5   :  { %v598_v6 = vadd.f32 %v597_v57, %v551_v63  ;;  %v431_v7 = vadd.f32 %v430_v4, %v2069_v25  ;;  %v893_v8 = vadd.f32 %v892_v5, %v2069_v25  ;;  %v432_v9 = vpop.f32.mrb[35].mxu0  ;;  %v894_v10 = vpop.f32.mrb[3].mxu1 }
 0x1e6   :  { %v635_v11 = vadd.f32 %v634_v61, %v552_v2  ;;  %v433_v12 = vadd.f32 %v432_v9, %v2071_v27  ;;  %v895_v13 = vadd.f32 %v894_v10, %v2071_v27 }
 0x1e7   :  { %v553_v15 = vmax.f32 %v431_v7, 0.0  ;;  %v1079_v16 = vmax.f32 %v893_v8, 0.0 }
 0x1e8   :  { %v554_v19 = vmax.f32 %v433_v12, 0.0  ;;  %v1080_v20 = vmax.f32 %v895_v13, 0.0  ;;  %v436_v21 = vpop.f32.mrb[36].mxu0  ;;  %v898_v22 = vpop.f32.mrb[4].mxu1 }
 0x1e9   :  { %v599_v23 = vadd.f32 %v598_v6, %v553_v15  ;;  %v1141_v24 = vadd.f32 %v1079_v16, %v1077_v14  ;;  %v437_v26 = vadd.f32 %v436_v21, %v2069_v25  ;;  %v899_v28 = vadd.f32 %v898_v22, %v2069_v25  ;;  %v438_v29 = vpop.f32.mrb[37].mxu0  ;;  %v900_v30 = vpop.f32.mrb[5].mxu1 }
 0x1ea   :  { %v636_v31 = vadd.f32 %v635_v11, %v554_v19  ;;  %v1178_v32 = vadd.f32 %v1080_v20, %v1078_v17  ;;  %v439_v33 = vadd.f32 %v438_v29, %v2071_v27  ;;  %v901_v34 = vadd.f32 %v900_v30, %v2071_v27 }
 0x1eb   :  { %v555_v35 = vmax.f32 %v437_v26, 0.0  ;;  %v1081_v36 = vmax.f32 %v899_v28, 0.0  ;;  %v1248_v26 = vld [vmem:[#allocation8 + $0x60] sm:$0xff] }
 0x1ec   :  { %v556_v37 = vmax.f32 %v439_v33, 0.0  ;;  %v1082_v38 = vmax.f32 %v901_v34, 0.0  ;;  %v442_v39 = vpop.f32.mrb[38].mxu0  ;;  %v904_v40 = vpop.f32.mrb[6].mxu1  ;;  %v1249_v33 = vld [vmem:[#allocation8 + $0x68] sm:$0xff]  ;;  %v1266_v34 = vld [vmem:[#allocation8 + $0xf0] sm:$0xff] }
 0x1ed   :  { %v600_v41 = vadd.f32 %v599_v23, %v555_v35  ;;  %v1142_v42 = vadd.f32 %v1141_v24, %v1081_v36  ;;  %v443_v43 = vadd.f32 %v442_v39, %v2069_v25  ;;  %v905_v44 = vadd.f32 %v904_v40, %v2069_v25  ;;  %v444_v45 = vpop.f32.mrb[39].mxu0  ;;  %v906_v46 = vpop.f32.mrb[7].mxu1  ;;  %v1264_v23 = vld [vmem:[#allocation8 + $0xe0] sm:$0xff]  ;;  %v1265_v24 = vld [vmem:[#allocation8 + $0xe8] sm:$0xff] }
 0x1ee   :  { %v637_v47 = vadd.f32 %v636_v31, %v556_v37  ;;  %v1179_v48 = vadd.f32 %v1178_v32, %v1082_v38  ;;  %v445_v49 = vadd.f32 %v444_v45, %v2071_v27  ;;  %v907_v50 = vadd.f32 %v906_v46, %v2071_v27 }
 0x1ef   :  { %v557_v51 = vmax.f32 %v443_v43, 0.0  ;;  %v1083_v52 = vmax.f32 %v905_v44, 0.0  ;;  %v1658_v32 = vpack.c.bf16 %v1265_v24, %v1264_v23  ;;  %v1251_v43 = vld [vmem:[#allocation8 + $0x78] sm:$0xff]  ;;  %v1359_v23 = vld [vmem:[#allocation9 + $0x10] sm:$0xff] }
 0x1f0   :  { %v558_v53 = vmax.f32 %v445_v49, 0.0  ;;  %v1084_v54 = vmax.f32 %v907_v50, 0.0  ;;  %v448_v55 = vpop.f32.mrb[40].mxu0  ;;  %v910_v56 = vpop.f32.mrb[8].mxu1  ;;  %v1660_v50 = vpack.c.bf16 %v1249_v33, %v1248_v26 }
 0x1f1   :  { %v601_v57 = vadd.f32 %v600_v41, %v557_v51  ;;  %v1143_v58 = vadd.f32 %v1142_v42, %v1083_v52  ;;  %v449_v59 = vadd.f32 %v448_v55, %v2069_v25  ;;  %v911_v60 = vadd.f32 %v910_v56, %v2069_v25  ;;  %v450_v61 = vpop.f32.mrb[41].mxu0  ;;  %v912_v62 = vpop.f32.mrb[9].mxu1  ;;  %v1267_v41 = vld [vmem:[#allocation8 + $0xf8] sm:$0xff]  ;;  %v1250_v42 = vld [vmem:[#allocation8 + $0x70] sm:$0xff]  ;;  %1659 = vmatprep.subr.bf16.mxu0 %v1658_v32 }
 0x1f2   :  { %v638_v63 = vadd.f32 %v637_v47, %v558_v53  ;;  %v1180_v1 = vadd.f32 %v1179_v48, %v1084_v54  ;;  %v451_v2 = vadd.f32 %v450_v61, %v2071_v27  ;;  %v913_v3 = vadd.f32 %v912_v62, %v2071_v27  ;;  %1661 = vmatpush3.bf16.msra.mxu0 %v1660_v50 }
 0x1f3   :  { %v559_v4 = vmax.f32 %v449_v59, 0.0  ;;  %v1085_v5 = vmax.f32 %v911_v60, 0.0  ;;  %v1662_v51 = vpack.c.bf16 %v1267_v41, %v1266_v34  ;;  %v1664_v56 = vpack.c.bf16 %v1251_v43, %v1250_v42  ;;  %v1361_v42 = vld [vmem:[#allocation9 + $0x20] sm:$0xff]  ;;  %v1362_v43 = vld [vmem:[#allocation9 + $0x28] sm:$0xff] }
 0x1f4   :  { %v560_v6 = vmax.f32 %v451_v2, 0.0  ;;  %v1086_v7 = vmax.f32 %v913_v3, 0.0  ;;  %v454_v8 = vpop.f32.mrb[42].mxu0  ;;  %v916_v9 = vpop.f32.mrb[10].mxu1  ;;  %v1834_v34 = vmov 0.0|0.0  }
 0x1f5   :  { %v602_v10 = vadd.f32 %v601_v57, %v559_v4  ;;  %v1144_v11 = vadd.f32 %v1143_v58, %v1085_v5  ;;  %v455_v12 = vadd.f32 %v454_v8, %v2069_v25  ;;  %v917_v13 = vadd.f32 %v916_v9, %v2069_v25  ;;  %v456_v14 = vpop.f32.mrb[43].mxu0  ;;  %v918_v15 = vpop.f32.mrb[11].mxu1  ;;  %1663 = vmatprep.subr.bf16.mxu0 %v1662_v51 }
 0x1f6   :  { %v639_v16 = vadd.f32 %v638_v63, %v560_v6  ;;  %v1181_v17 = vadd.f32 %v1180_v1, %v1086_v7  ;;  %v457_v19 = vadd.f32 %v456_v14, %v2071_v27  ;;  %v919_v20 = vadd.f32 %v918_v15, %v2071_v27  ;;  %1665 = vmatpush3.bf16.msra.mxu0 %v1664_v56 }
 0x1f7   :  { %v561_v21 = vmax.f32 %v455_v12, 0.0  ;;  %v1087_v22 = vmax.f32 %v917_v13, 0.0  ;;  %1666 = vmatprep.subr.bf16.mxu1 %v1834_v34 }
 0x1f8   :  { %v562_v28 = vmax.f32 %v457_v19, 0.0  ;;  %v1088_v29 = vmax.f32 %v919_v20, 0.0  ;;  %v460_v30 = vpop.f32.mrb[44].mxu0  ;;  %v922_v31 = vpop.f32.mrb[12].mxu1 }
 0x1f9   :  { %v603_v35 = vadd.f32 %v602_v10, %v561_v21  ;;  %v1145_v36 = vadd.f32 %v1144_v11, %v1087_v22  ;;  %v461_v37 = vadd.f32 %v460_v30, %v2069_v25  ;;  %v923_v38 = vadd.f32 %v922_v31, %v2069_v25  ;;  %v462_v39 = vpop.f32.mrb[45].mxu0  ;;  %v924_v40 = vpop.f32.mrb[13].mxu1  ;;  %v1357_v21 = vld [vmem:[#allocation9] sm:$0xff]  ;;  %v1358_v22 = vld [vmem:[#allocation9 + $0x8] sm:$0xff] }
 0x1fa   :  { %v640_v44 = vadd.f32 %v639_v16, %v562_v28  ;;  %v1182_v45 = vadd.f32 %v1181_v17, %v1088_v29  ;;  %v463_v46 = vadd.f32 %v462_v39, %v2071_v27  ;;  %v925_v47 = vadd.f32 %v924_v40, %v2071_v27  ;;  %v1360_v29 = vld [vmem:[#allocation9 + $0x18] sm:$0xff] }
 0x1fb   :  { %v563_v48 = vmax.f32 %v461_v37, 0.0  ;;  %v1089_v49 = vmax.f32 %v923_v38, 0.0  ;;  %v1667_v28 = vpack.c.bf16 %v1358_v22, %v1357_v21 }
 0x1fc   :  { %v564_v52 = vmax.f32 %v463_v46, 0.0  ;;  %v1090_v53 = vmax.f32 %v925_v47, 0.0  ;;  %v466_v54 = vpop.f32.mrb[46].mxu0  ;;  %v928_v55 = vpop.f32.mrb[14].mxu1 }
 0x1fd   :  { %v604_v57 = vadd.f32 %v603_v35, %v563_v48  ;;  %v1146_v58 = vadd.f32 %v1145_v36, %v1089_v49  ;;  %v467_v59 = vadd.f32 %v466_v54, %v2069_v25  ;;  %v929_v60 = vadd.f32 %v928_v55, %v2069_v25  ;;  %v468_v61 = vpop.f32.mrb[47].mxu0  ;;  %v930_v62 = vpop.f32.mrb[15].mxu1  ;;  %1668 = vmatpush3.bf16.msra.mxu1 %v1667_v28 }
 0x1fe   :  { %v641_v63 = vadd.f32 %v640_v44, %v564_v52  ;;  %v1183_v1 = vadd.f32 %v1182_v45, %v1090_v53  ;;  %v469_v2 = vadd.f32 %v468_v61, %v2071_v27  ;;  %v931_v3 = vadd.f32 %v930_v62, %v2071_v27  ;;  %1669 = vmatprep.subr.bf16.mxu1 %v1834_v34  ;;  %v1363_v61 = vld [vmem:[#allocation9 + $0x30] sm:$0xff]  ;;  %v1364_v62 = vld [vmem:[#allocation9 + $0x38] sm:$0xff] }
 0x1ff   :  { %v565_v4 = vmax.f32 %v467_v59, 0.0  ;;  %v1091_v5 = vmax.f32 %v929_v60, 0.0  ;;  %v1670_v35 = vpack.c.bf16 %v1360_v29, %v1359_v23  ;;  %v1673_v54 = vpack.c.bf16 %v1362_v43, %v1361_v42 }
 0x200   :  { %v566_v6 = vmax.f32 %v469_v2, 0.0  ;;  %v1092_v7 = vmax.f32 %v931_v3, 0.0  ;;  %v472_v8 = vpop.f32.mrb[48].mxu0  ;;  %v934_v9 = vpop.f32.mrb[16].mxu1 }
 0x201   :  { %v605_v10 = vadd.f32 %v604_v57, %v565_v4  ;;  %v1147_v11 = vadd.f32 %v1146_v58, %v1091_v5  ;;  %v473_v12 = vadd.f32 %v472_v8, %v2069_v25  ;;  %v935_v13 = vadd.f32 %v934_v9, %v2069_v25  ;;  %v474_v14 = vpop.f32.mrb[49].mxu0  ;;  %v936_v15 = vpop.f32.mrb[17].mxu1  ;;  %1671 = vmatpush3.bf16.msra.mxu1 %v1670_v35 }
 0x202   :  { %v642_v16 = vadd.f32 %v641_v63, %v566_v6  ;;  %v1184_v17 = vadd.f32 %v1183_v1, %v1092_v7  ;;  %v475_v19 = vadd.f32 %v474_v14, %v2071_v27  ;;  %v937_v20 = vadd.f32 %v936_v15, %v2071_v27  ;;  %1672 = vmatprep.subr.bf16.mxu1 %v1834_v34 }
 0x203   :  { %v567_v24 = vmax.f32 %v473_v12, 0.0  ;;  %v1093_v26 = vmax.f32 %v935_v13, 0.0 }
 0x204   :  { %v568_v30 = vmax.f32 %v475_v19, 0.0  ;;  %v1094_v31 = vmax.f32 %v937_v20, 0.0  ;;  %v478_v32 = vpop.f32.mrb[50].mxu0  ;;  %v940_v33 = vpop.f32.mrb[18].mxu1  ;;  %v1366_v19 = vld [vmem:[#allocation9 + $0x48] sm:$0xff] }
 0x205   :  { %v606_v36 = vadd.f32 %v605_v10, %v567_v24  ;;  %v1148_v37 = vadd.f32 %v1147_v11, %v1093_v26  ;;  %v479_v38 = vadd.f32 %v478_v32, %v2069_v25  ;;  %v941_v39 = vadd.f32 %v940_v33, %v2069_v25  ;;  %v480_v40 = vpop.f32.mrb[51].mxu0  ;;  %v942_v41 = vpop.f32.mrb[19].mxu1  ;;  %1674 = vmatpush3.bf16.msra.mxu1 %v1673_v54 }
 0x206   :  { %v643_v44 = vadd.f32 %v642_v16, %v568_v30  ;;  %v1185_v45 = vadd.f32 %v1184_v17, %v1094_v31  ;;  %v481_v46 = vadd.f32 %v480_v40, %v2071_v27  ;;  %v943_v47 = vadd.f32 %v942_v41, %v2071_v27  ;;  %v1365_v17 = vld [vmem:[#allocation9 + $0x40] sm:$0xff]  ;;  %1675 = vmatprep.subr.bf16.mxu1 %v1834_v34  ;;  %v1367_v40 = vld [vmem:[#allocation9 + $0x50] sm:$0xff]  ;;  %v1368_v41 = vld [vmem:[#allocation9 + $0x58] sm:$0xff] }
 0x207   :  { %v569_v48 = vmax.f32 %v479_v38, 0.0  ;;  %v1095_v49 = vmax.f32 %v941_v39, 0.0  ;;  %v1676_v10 = vpack.c.bf16 %v1364_v62, %v1363_v61  ;;  %v1679_v32 = vpack.c.bf16 %v1366_v19, %v1365_v17 }
 0x208   :  { %v570_v50 = vmax.f32 %v481_v46, 0.0  ;;  %v1096_v51 = vmax.f32 %v943_v47, 0.0  ;;  %v484_v52 = vpop.f32.mrb[52].mxu0  ;;  %v946_v53 = vpop.f32.mrb[20].mxu1 }
 0x209   :  { %v607_v55 = vadd.f32 %v606_v36, %v569_v48  ;;  %v1149_v56 = vadd.f32 %v1148_v37, %v1095_v49  ;;  %v485_v57 = vadd.f32 %v484_v52, %v2069_v25  ;;  %v947_v58 = vadd.f32 %v946_v53, %v2069_v25  ;;  %v486_v59 = vpop.f32.mrb[53].mxu0  ;;  %v948_v60 = vpop.f32.mrb[21].mxu1  ;;  %1677 = vmatpush3.bf16.msra.mxu1 %v1676_v10 }
 0x20a   :  { %v644_v63 = vadd.f32 %v643_v44, %v570_v50  ;;  %v1186_v1 = vadd.f32 %v1185_v45, %v1096_v51  ;;  %v487_v2 = vadd.f32 %v486_v59, %v2071_v27  ;;  %v949_v3 = vadd.f32 %v948_v60, %v2071_v27  ;;  %1678 = vmatprep.subr.bf16.mxu1 %v1834_v34  ;;  %v1369_v59 = vld [vmem:[#allocation9 + $0x60] sm:$0xff]  ;;  %v1370_v60 = vld [vmem:[#allocation9 + $0x68] sm:$0xff] }
 0x20b   :  { %v571_v4 = vmax.f32 %v485_v57, 0.0  ;;  %v1097_v5 = vmax.f32 %v947_v58, 0.0  ;;  %v1682_v52 = vpack.c.bf16 %v1368_v41, %v1367_v40 }
 0x20c   :  { %v572_v6 = vmax.f32 %v487_v2, 0.0  ;;  %v1098_v7 = vmax.f32 %v949_v3, 0.0  ;;  %v490_v8 = vpop.f32.mrb[54].mxu0  ;;  %v952_v9 = vpop.f32.mrb[22].mxu1 }
 0x20d   :  { %v608_v11 = vadd.f32 %v607_v55, %v571_v4  ;;  %v1150_v12 = vadd.f32 %v1149_v56, %v1097_v5  ;;  %v491_v13 = vadd.f32 %v490_v8, %v2069_v25  ;;  %v953_v14 = vadd.f32 %v952_v9, %v2069_v25  ;;  %v492_v15 = vpop.f32.mrb[55].mxu0  ;;  %v954_v16 = vpop.f32.mrb[23].mxu1  ;;  %1680 = vmatpush3.bf16.msra.mxu1 %v1679_v32 }
 0x20e   :  { %v645_v20 = vadd.f32 %v644_v63, %v572_v6  ;;  %v1187_v21 = vadd.f32 %v1186_v1, %v1098_v7  ;;  %v493_v22 = vadd.f32 %v492_v15, %v2071_v27  ;;  %v955_v23 = vadd.f32 %v954_v16, %v2071_v27  ;;  %1681 = vmatprep.subr.bf16.mxu1 %v1834_v34  ;;  %v1371_v15 = vld [vmem:[#allocation9 + $0x70] sm:$0xff]  ;;  %v1372_v16 = vld [vmem:[#allocation9 + $0x78] sm:$0xff] }
 0x20f   :  { %v573_v24 = vmax.f32 %v491_v13, 0.0  ;;  %v1099_v26 = vmax.f32 %v953_v14, 0.0  ;;  %v1685_v8 = vpack.c.bf16 %v1370_v60, %v1369_v59 }
 0x210   :  { %v574_v28 = vmax.f32 %v493_v22, 0.0  ;;  %v1100_v29 = vmax.f32 %v955_v23, 0.0  ;;  %v496_v30 = vpop.f32.mrb[56].mxu0  ;;  %v958_v31 = vpop.f32.mrb[24].mxu1 }
 0x211   :  { %v609_v33 = vadd.f32 %v608_v11, %v573_v24  ;;  %v1151_v35 = vadd.f32 %v1150_v12, %v1099_v26  ;;  %v497_v36 = vadd.f32 %v496_v30, %v2069_v25  ;;  %v959_v37 = vadd.f32 %v958_v31, %v2069_v25  ;;  %v498_v38 = vpop.f32.mrb[57].mxu0  ;;  %v960_v39 = vpop.f32.mrb[25].mxu1  ;;  %1683 = vmatpush3.bf16.msra.mxu1 %v1682_v52 }
 0x212   :  { %v646_v42 = vadd.f32 %v645_v20, %v574_v28  ;;  %v1188_v43 = vadd.f32 %v1187_v21, %v1100_v29  ;;  %v499_v44 = vadd.f32 %v498_v38, %v2071_v27  ;;  %v961_v45 = vadd.f32 %v960_v39, %v2071_v27  ;;  %1684 = vmatprep.subr.bf16.mxu1 %v1834_v34 }
 0x213   :  { %v575_v46 = vmax.f32 %v497_v36, 0.0  ;;  %v1101_v47 = vmax.f32 %v959_v37, 0.0  ;;  %v1688_v30 = vpack.c.bf16 %v1372_v16, %v1371_v15 }
 0x214   :  { %v576_v48 = vmax.f32 %v499_v44, 0.0  ;;  %v1102_v49 = vmax.f32 %v961_v45, 0.0  ;;  %v502_v50 = vpop.f32.mrb[58].mxu0  ;;  %v964_v51 = vpop.f32.mrb[26].mxu1 }
 0x215   :  { %v610_v53 = vadd.f32 %v609_v33, %v575_v46  ;;  %v1152_v54 = vadd.f32 %v1151_v35, %v1101_v47  ;;  %v503_v55 = vadd.f32 %v502_v50, %v2069_v25  ;;  %v965_v56 = vadd.f32 %v964_v51, %v2069_v25  ;;  %v504_v57 = vpop.f32.mrb[59].mxu0  ;;  %v966_v58 = vpop.f32.mrb[27].mxu1  ;;  %1686 = vmatpush3.bf16.msra.mxu1 %v1685_v8 }
 0x216   :  { %v647_v61 = vadd.f32 %v646_v42, %v576_v48  ;;  %v1189_v62 = vadd.f32 %v1188_v43, %v1102_v49  ;;  %v505_v63 = vadd.f32 %v504_v57, %v2071_v27  ;;  %v967_v1 = vadd.f32 %v966_v58, %v2071_v27  ;;  %1687 = vmatprep.subr.bf16.mxu1 %v1834_v34 }
 0x217   :  { %v577_v2 = vmax.f32 %v503_v55, 0.0  ;;  %v1103_v3 = vmax.f32 %v965_v56, 0.0 }
 0x218   :  { %v578_v4 = vmax.f32 %v505_v63, 0.0  ;;  %v1104_v5 = vmax.f32 %v967_v1, 0.0  ;;  %v508_v6 = vpop.f32.mrb[60].mxu0  ;;  %v970_v7 = vpop.f32.mrb[28].mxu1 }
 0x219   :  { %v611_v9 = vadd.f32 %v610_v53, %v577_v2  ;;  %v1153_v10 = vadd.f32 %v1152_v54, %v1103_v3  ;;  %v509_v11 = vadd.f32 %v508_v6, %v2069_v25  ;;  %v971_v12 = vadd.f32 %v970_v7, %v2069_v25  ;;  %v510_v13 = vpop.f32.mrb[61].mxu0  ;;  %v972_v14 = vpop.f32.mrb[29].mxu1  ;;  %1689 = vmatpush3.bf16.msra.mxu1 %v1688_v30 }
 0x21a   :  { %v648_v17 = vadd.f32 %v647_v61, %v578_v4  ;;  %v1190_v19 = vadd.f32 %v1189_v62, %v1104_v5  ;;  %v511_v20 = vadd.f32 %v510_v13, %v2071_v27  ;;  %v973_v21 = vadd.f32 %v972_v14, %v2071_v27 }
 0x21b   :  { %v579_v22 = vmax.f32 %v509_v11, 0.0  ;;  %v1105_v23 = vmax.f32 %v971_v12, 0.0 }
 0x21c   :  { %v580_v24 = vmax.f32 %v511_v20, 0.0  ;;  %v1106_v26 = vmax.f32 %v973_v21, 0.0  ;;  %v514_v28 = vpop.f32.mrb[62].mxu0  ;;  %v976_v29 = vpop.f32.mrb[30].mxu1 }
 0x21d   :  { %v612_v31 = vadd.f32 %v611_v9, %v579_v22  ;;  %v1154_v32 = vadd.f32 %v1153_v10, %v1105_v23  ;;  %v515_v33 = vadd.f32 %v514_v28, %v2069_v25  ;;  %v977_v35 = vadd.f32 %v976_v29, %v2069_v25  ;;  %v516_v36 = vpop.f32.mrb[63].mxu0  ;;  %v978_v37 = vpop.f32.mrb[31].mxu1 }
 0x21e   :  { %v649_v38 = vadd.f32 %v648_v17, %v580_v24  ;;  %v1191_v39 = vadd.f32 %v1190_v19, %v1106_v26  ;;  %v517_v40 = vadd.f32 %v516_v36, %v2071_v27  ;;  %v979_v41 = vadd.f32 %v978_v37, %v2071_v27 }
 0x21f   :  { %v581_v42 = vmax.f32 %v515_v33, 0.0  ;;  %v1107_v43 = vmax.f32 %v977_v35, 0.0 }
 0x220   :  { %v582_v44 = vmax.f32 %v517_v40, 0.0  ;;  %v1108_v45 = vmax.f32 %v979_v41, 0.0  ;;  %v982_v46 = vpop.f32.mrb[32].mxu1 }
 0x221   :  { %v2177_v47 = vadd.f32 %v612_v31, %v581_v42  ;;  %v1155_v48 = vadd.f32 %v1154_v32, %v1107_v43  ;;  %v983_v49 = vadd.f32 %v982_v46, %v2069_v25  ;;  %v984_v50 = vpop.f32.mrb[33].mxu1 }
 0x222   :  { %v2180_v51 = vadd.f32 %v649_v38, %v582_v44  ;;  %v1192_v52 = vadd.f32 %v1191_v39, %v1108_v45  ;;  %v985_v53 = vadd.f32 %v984_v50, %v2071_v27 }
 0x223   :  { %v1109_v54 = vmax.f32 %v983_v49, 0.0 }
 0x224   :  { %v1110_v55 = vmax.f32 %v985_v53, 0.0  ;;  %v988_v34 = vpop.f32.mrb[34].mxu1 }
 0x225   :  { %v1156_v56 = vadd.f32 %v1155_v48, %v1109_v54  ;;  %v989_v57 = vadd.f32 %v988_v34, %v2069_v25  ;;  %v990_v58 = vpop.f32.mrb[35].mxu1 }
 0x226   :  { %v1193_v59 = vadd.f32 %v1192_v52, %v1110_v55  ;;  %v991_v60 = vadd.f32 %v990_v58, %v2071_v27 }
 0x227   :  { %v1111_v61 = vmax.f32 %v989_v57, 0.0 }
 0x228   :  { %v1112_v62 = vmax.f32 %v991_v60, 0.0  ;;  %v994_v63 = vpop.f32.mrb[36].mxu1 }
 0x229   :  { %v1157_v1 = vadd.f32 %v1156_v56, %v1111_v61  ;;  %v995_v2 = vadd.f32 %v994_v63, %v2069_v25  ;;  %v996_v3 = vpop.f32.mrb[37].mxu1 }
 0x22a   :  { %v1194_v4 = vadd.f32 %v1193_v59, %v1112_v62  ;;  %v997_v5 = vadd.f32 %v996_v3, %v2071_v27 }
 0x22b   :  { %v1113_v6 = vmax.f32 %v995_v2, 0.0 }
 0x22c   :  { %v1114_v7 = vmax.f32 %v997_v5, 0.0  ;;  %v1000_v8 = vpop.f32.mrb[38].mxu1 }
 0x22d   :  { %v1158_v9 = vadd.f32 %v1157_v1, %v1113_v6  ;;  %v1001_v10 = vadd.f32 %v1000_v8, %v2069_v25  ;;  %v1002_v11 = vpop.f32.mrb[39].mxu1 }
 0x22e   :  { %v1195_v12 = vadd.f32 %v1194_v4, %v1114_v7  ;;  %v1003_v13 = vadd.f32 %v1002_v11, %v2071_v27 }
 0x22f   :  { %v1115_v14 = vmax.f32 %v1001_v10, 0.0 }
 0x230   :  { %v1116_v15 = vmax.f32 %v1003_v13, 0.0  ;;  %v1006_v16 = vpop.f32.mrb[40].mxu1 }
 0x231   :  { %v1159_v17 = vadd.f32 %v1158_v9, %v1115_v14  ;;  %v1007_v19 = vadd.f32 %v1006_v16, %v2069_v25  ;;  %v1008_v20 = vpop.f32.mrb[41].mxu1 }
 0x232   :  { %v1196_v21 = vadd.f32 %v1195_v12, %v1116_v15  ;;  %v1009_v22 = vadd.f32 %v1008_v20, %v2071_v27 }
 0x233   :  { %v1117_v23 = vmax.f32 %v1007_v19, 0.0 }
 0x234   :  { %v1118_v24 = vmax.f32 %v1009_v22, 0.0  ;;  %v1012_v26 = vpop.f32.mrb[42].mxu1 }
 0x235   :  { %v1160_v28 = vadd.f32 %v1159_v17, %v1117_v23  ;;  %v1013_v29 = vadd.f32 %v1012_v26, %v2069_v25  ;;  %v1014_v30 = vpop.f32.mrb[43].mxu1 }
 0x236   :  { %v1197_v31 = vadd.f32 %v1196_v21, %v1118_v24  ;;  %v1015_v32 = vadd.f32 %v1014_v30, %v2071_v27 }
 0x237   :  { %v1119_v33 = vmax.f32 %v1013_v29, 0.0 }
 0x238   :  { %v1120_v35 = vmax.f32 %v1015_v32, 0.0  ;;  %v1018_v36 = vpop.f32.mrb[44].mxu1 }
 0x239   :  { %v1161_v37 = vadd.f32 %v1160_v28, %v1119_v33  ;;  %v1019_v38 = vadd.f32 %v1018_v36, %v2069_v25  ;;  %v1020_v39 = vpop.f32.mrb[45].mxu1 }
 0x23a   :  { %v1198_v40 = vadd.f32 %v1197_v31, %v1120_v35  ;;  %v1021_v41 = vadd.f32 %v1020_v39, %v2071_v27 }
 0x23b   :  { %v1121_v42 = vmax.f32 %v1019_v38, 0.0 }
 0x23c   :  { %v1122_v43 = vmax.f32 %v1021_v41, 0.0  ;;  %v1024_v44 = vpop.f32.mrb[46].mxu1 }
 0x23d   :  { %v1162_v45 = vadd.f32 %v1161_v37, %v1121_v42  ;;  %v1025_v46 = vadd.f32 %v1024_v44, %v2069_v25  ;;  %v1026_v48 = vpop.f32.mrb[47].mxu1 }
 0x23e   :  { %v1199_v49 = vadd.f32 %v1198_v40, %v1122_v43  ;;  %v1027_v50 = vadd.f32 %v1026_v48, %v2071_v27  ;;  %v614_v43 = vrot.slane %v2177_v47, 4  ;;  %v651_v48 = vrot.slane %v2180_v51, 4 }
 0x23f   :  { %v1123_v52 = vmax.f32 %v1025_v46, 0.0 }
 0x240   :  { %v1124_v53 = vmax.f32 %v1027_v50, 0.0  ;;  %v1030_v54 = vpop.f32.mrb[48].mxu1 }
 0x241   :  { %v1163_v55 = vadd.f32 %v1162_v45, %v1123_v52  ;;  %v1031_v34 = vadd.f32 %v1030_v54, %v2069_v25  ;;  %v1032_v56 = vpop.f32.mrb[49].mxu1 }
 0x242   :  { %v1200_v57 = vadd.f32 %v1199_v49, %v1124_v53  ;;  %v1033_v58 = vadd.f32 %v1032_v56, %v2071_v27 }
 0x243   :  { %v1125_v59 = vmax.f32 %v1031_v34, 0.0 }
 0x244   :  { %v1126_v60 = vmax.f32 %v1033_v58, 0.0  ;;  %v1036_v61 = vpop.f32.mrb[50].mxu1  ;;  %v652_v58 = vadd.f32 %v651_v48, %v2180_v51 }
 0x245   :  { %v1164_v62 = vadd.f32 %v1163_v55, %v1125_v59  ;;  %v1037_v63 = vadd.f32 %v1036_v61, %v2069_v25  ;;  %v1038_v1 = vpop.f32.mrb[51].mxu1  ;;  %v615_v55 = vadd.f32 %v614_v43, %v2177_v47 }
 0x246   :  { %v1201_v2 = vadd.f32 %v1200_v57, %v1126_v60  ;;  %v1039_v3 = vadd.f32 %v1038_v1, %v2071_v27 }
 0x247   :  { %v1127_v4 = vmax.f32 %v1037_v63, 0.0  ;;  %v616_v63 = vrot.slane %v615_v55, 2 }
 0x248   :  { %v1128_v5 = vmax.f32 %v1039_v3, 0.0  ;;  %v1042_v6 = vpop.f32.mrb[52].mxu1 }
 0x249   :  { %v1165_v7 = vadd.f32 %v1164_v62, %v1127_v4  ;;  %v1043_v8 = vadd.f32 %v1042_v6, %v2069_v25  ;;  %v1044_v9 = vpop.f32.mrb[53].mxu1  ;;  %v617_v6 = vadd.f32 %v616_v63, %v615_v55 }
 0x24a   :  { %v1202_v10 = vadd.f32 %v1201_v2, %v1128_v5  ;;  %v1045_v11 = vadd.f32 %v1044_v9, %v2071_v27  ;;  %v653_v2 = vrot.slane %v652_v58, 2 }
 0x24b   :  { %v1129_v12 = vmax.f32 %v1043_v8, 0.0  ;;  %v618_v51 = vrot.slane %v617_v6, 1 }
 0x24c   :  { %v1130_v13 = vmax.f32 %v1045_v11, 0.0  ;;  %v1048_v14 = vpop.f32.mrb[54].mxu1  ;;  %v654_v47 = vadd.f32 %v653_v2, %v652_v58 }
 0x24d   :  { %v1166_v15 = vadd.f32 %v1165_v7, %v1129_v12  ;;  %v1049_v16 = vadd.f32 %v1048_v14, %v2069_v25  ;;  %v1050_v17 = vpop.f32.mrb[55].mxu1 }
 0x24e   :  { %v1203_v19 = vadd.f32 %v1202_v10, %v1130_v13  ;;  %v1051_v20 = vadd.f32 %v1050_v17, %v2071_v27  ;;  %v655_v13 = vrot.slane %v654_v47, 1  ;;  %v619_v17 = vadd.f32 %v618_v51, %v617_v6 }
 0x24f   :  { %v1131_v21 = vmax.f32 %v1049_v16, 0.0 }
 0x250   :  { %v1132_v22 = vmax.f32 %v1051_v20, 0.0  ;;  %v1054_v23 = vpop.f32.mrb[56].mxu1  ;;  %v656_v20 = vadd.f32 %v655_v13, %v654_v47 }
 0x251   :  { %v1167_v24 = vadd.f32 %v1166_v15, %v1131_v21  ;;  %v1055_v26 = vadd.f32 %v1054_v23, %v2069_v25  ;;  %v1056_v28 = vpop.f32.mrb[57].mxu1 }
 0x252   :  { %v1204_v29 = vadd.f32 %v1203_v19, %v1132_v22  ;;  %v1057_v30 = vadd.f32 %v1056_v28, %v2071_v27  ;;  %v1215_v28 = vld [vmem:[#allocation2] sm:$0xf] }
 0x253   :  { %v1133_v31 = vmax.f32 %v1055_v26, 0.0 }
 0x254   :  { %v1134_v32 = vmax.f32 %v1057_v30, 0.0  ;;  %v1060_v33 = vpop.f32.mrb[58].mxu1 }
 0x255   :  { %v1168_v35 = vadd.f32 %v1167_v24, %v1133_v31  ;;  %v1061_v36 = vadd.f32 %v1060_v33, %v2069_v25  ;;  %v1062_v37 = vpop.f32.mrb[59].mxu1 }
 0x256   :  { %v1205_v38 = vadd.f32 %v1204_v29, %v1134_v32  ;;  %v1063_v39 = vadd.f32 %v1062_v37, %v2071_v27 }
 0x257   :  { %v1135_v40 = vmax.f32 %v1061_v36, 0.0 }
 0x258   :  { %v1136_v41 = vmax.f32 %v1063_v39, 0.0  ;;  %v1066_v42 = vpop.f32.mrb[60].mxu1  ;;  %v1546_v39 = vld [vmem:[%s2243_s6] ss:$0 sm:$0xff] }
 0x259   :  { %v1169_v44 = vadd.f32 %v1168_v35, %v1135_v40  ;;  %v1067_v45 = vadd.f32 %v1066_v42, %v2069_v25  ;;  %v1068_v46 = vpop.f32.mrb[61].mxu1  ;;  %v1544_v35 = vld [vmem:[%s2241_s4] ss:$0 sm:$0xff]  ;;  %s1837_s4 = smov [#allocation11]  }
 0x25a   :  { %v1206_v49 = vadd.f32 %v1205_v38, %v1136_v41  ;;  %v1069_v50 = vadd.f32 %v1068_v46, %v2071_v27  ;;  %s1469_s8 = sshll.u32 %s1837_s4, 4  ;;  %s1470_s8 = int_to_ptr.vmem [resolvable:$true] %s1469_s8 }
 0x25b   :  { %v1137_v52 = vmax.f32 %v1067_v45, 0.0  ;;  %s1795_s6 = scalar_lea.vmem %s1470_s8, 32  ;;  %p1800_p5 = scmp.lt.s32.totalorder %s1470_s8, %s1470_s8 }
 0x25c   :  { %v1138_v53 = vmax.f32 %v1069_v50, 0.0  ;;  %v1072_v54 = vpop.f32.mrb[62].mxu1  ;;  %p1796_p4 = scmp.ne.s32.totalorder %s1470_s8, %s1795_s6  ;;  %p1801_p6 = scmp.lt.s32.totalorder %s1795_s6, %s1795_s6 }
 0x25d   :  { %v1170_v34 = vadd.f32 %v1169_v44, %v1137_v52  ;;  %v1073_v56 = vadd.f32 %v1072_v54, %v2069_v25  ;;  %v1074_v57 = vpop.f32.mrb[63].mxu1  ;;  %v1835_v25 = vmov 1983009808  }
 0x25e   :  { %v1207_v59 = vadd.f32 %v1206_v49, %v1138_v53  ;;  %v1075_v60 = vadd.f32 %v1074_v57, %v2071_v27  ;;  %v1223_v10 = vunpack.c.l.s4 %v1835_v25  ;;  %p1802_p7 = por %p1801_p6, %p1800_p5 }
 0x25f   :  { %v1139_v61 = vmax.f32 %v1073_v56, 0.0 }
 0x260   :  { %v1140_v62 = vmax.f32 %v1075_v60, 0.0  ;;  %v1224_v15 = vunpack.c.0.s8 %v1223_v10  ;;  %p1803_p8 = pnand %p1802_p7, %p1796_p4 }
 0x261   :  { %v1171_v1 = vadd.f32 %v1170_v34, %v1139_v61 }
 0x262   :  { %v1208_v3 = vadd.f32 %v1207_v59, %v1140_v62  ;;  %v1227_v23 = vsub.s32 %v1224_v15, %v2062_v18 }
 0x263   :  { %v1172_v4 = vrot.slane %v1171_v1, 4 }
 0x264   :  { %v1209_v5 = vrot.slane %v1208_v3, 4 }
 0x265   :  { %v1173_v7 = vadd.f32 %v1172_v4, %v1171_v1 }
 0x266   :  { %v1210_v8 = vadd.f32 %v1209_v5, %v1208_v3 }
 0x267   :  { %v1174_v9 = vrot.slane %v1173_v7, 2 }
 0x268   :  { %v1211_v11 = vrot.slane %v1210_v8, 2 }
 0x269   :  { %v1175_v12 = vadd.f32 %v1174_v9, %v1173_v7 }
 0x26a   :  { %v1212_v27 = vadd.f32 %v1211_v11, %v1210_v8 }
 0x26b   :  { %v1176_v14 = vrot.slane %v1175_v12, 1 }
 0x26c   :  { %v1213_v16 = vrot.slane %v1212_v27, 1 }
 0x26d   :  { %v1177_v19 = vadd.f32 %v1176_v14, %v1175_v12 }
 0x26e   :  { %v1214_v21 = vadd.f32 %v1213_v16, %v1212_v27 }
 0x26f   :  { %v1217_v22 = vsel %vm1216_vm1, %v619_v17, %v1177_v19 }
 0x270   :  { %v1218_v24 = vsel %vm1216_vm1, %v656_v20, %v1214_v21 }
 0x271   :  { %v1221_v26 = vcombine.low %v1217_v22, %v1218_v24 }
 0x273   :  { %v1228_v29 = vrot.slane %v1221_v26, %v1227_v23 }
 0x275   :  { %v1230_v30 = vadd.f32 %v1228_v29, %v1215_v28 }
 0x277   :  { %1231 = vst [vmem:[#allocation2] sm:$0xf] %v1230_v30 }
 0x27e   :  { %v1545_v31 = vld.sshfl [vmem:[#allocation2] sm:$0x33 pattern:$0x76325410] }
 0x27f   :  { %v1283_v32 = vcombine.high %v1545_v31, %v1545_v31 }
 0x281   :  { %1350 = vmatprep.mubr.f32.mxu0 %v1283_v32 }
 0x282   :  { %1351 = vmatmul.mubr.f32.vlgmr.msra.gmra.mrb[64].mxu0 %v1545_v31 }
 0x355   :  { %v1579_v33 = vpop.f32.mrb[64].mxu0 }
 0x356   :  { %v1580_v36 = vpop.f32.mrb[65].mxu0 }
 0x357   :  { %v1581_v18 = vadd.f32 %v1580_v36, %v1579_v33 }
 0x359   :  { %v1353_v37 = vadd.f32 %v1581_v18, %v1544_v35 }
 0x35b   :  { %v1356_v38 = vmax.f32 %v1353_v37, 0.0 }
 0x35d   :  { %1632 = vmatmul.mubr.f32.vlgmr.msra.gmra.mrb[64].mxu1 %v1356_v38 }
 0x430   :  { %v1446_v40 = vpop.f32.mrb[64].mxu1 }
 0x431   :  { %v1447_v41 = vadd.f32 %v1546_v39, %v1446_v40  ;;  %v1633_v42 = vpop.f32.mrb[65].mxu1 }
 0x433   :  { %v1451_v43 = vsel %vm1450_vm3, %v1447_v41, -inf }
 0x434   :  { %1452 = vmax.xlane.f32.xlu0 %v1451_v43 }
 0x4c1   :  { %v1453_v0 = vpop.xlane.xlu0 %1452 }
 0x4c2   :  { %v1454_v44 = vsub.f32 %v1447_v41, %v1453_v0 }
 0x4c4   :  { %v1455_v45 = vmul.f32 1.442695, %v1454_v44 }
 0x4c6   :  { %1703 = vpow2.f32 %v1455_v45 }
 0x4d0   :  { %v1704_v46 = vpop.eup %1703 }
 0x4d1   :  { %v1457_v48 = vsel %vm1450_vm3, %v1704_v46, 0.0 }
 0x4d2   :  { %1458 = vadd.xlane.f32.xlu1 %v1457_v48 }
 0x55f   :  { %v1459_v49 = vpop.xlane.xlu1 %1458 }
 0x560   :  { %1705 = vrcp.f32 %v1459_v49 }
 0x56a   :  { %v1706_v50 = vpop.eup %1705 }
 0x56b   :  { %v1461_v52 = vmul.f32 %v1706_v50, %v1704_v46 }
 0x56d   :  { %1462 = vst [vmem:[#allocation11] sm:$0x3] %v1461_v52 }
 0x56e   :  { %1806 = shalt.err (!%p1803_p8)
}
 0x56f   :  { %s1807_s11 = scalar_lea.hbm %s2244_s7, 32 }
 0x570   :  { %p1808_p9 = scmp.ne.s32.totalorder %s2244_s7, %s1807_s11  ;;  %p1811_p10 = scmp.lt.u32.totalorder %s1807_s11, %s2244_s7 }
 0x572   :  { %p1813_p11 = pnand %p1811_p10, %p1808_p9 }
 0x574   :  { %1816 = shalt.err (!%p1813_p11)
}
 0x575   :  { %1472 = dma.vmem_to_hbm [thread:$0]  %s1470_s8, 32, %s2244_s7, [#allocation5]  }
 0x576   :  { %1823 = dma.done.wait [#allocation5], 32  }
 0x577   :  { %1824 = vsyncadd [#allocation5], 4294967264 }
 0x578   :  { %1476 = vsyncpa [#allocation4], 1 }
 0x579   :  { %1477 = vsyncpa [#allocation7], 1 }
 0x57a   :  { %1478 = vsyncpa [#allocation10], 1 }
 0x57b   :  { %1479 = vsyncpa [#allocation5], 1 }

</bundles_post_ra>
